<compile_context>
chip_gen: v7x
topology: tpu7x:2x2x1
jax: 0.10.0
libtpu: 0.0.40
codegen_flags: <defaults>
</compile_context>

<pallas_src>
import numpy as np
import jax
import jax.numpy as jnp
from jax.experimental import pallas as pl
from jax.experimental.pallas import tpu as pltpu


# ----------------------------- Pallas kernel --------------------------------
def cbam_kernel(x_ref, w1t_ref, w2t_ref, mcat_ref, o_ref):
    x = x_ref[...].astype(jnp.float32)                       # (Bt, C, HW)
    Bt, C, HW = x.shape

    # ---------- Channel attention (AdaptiveMax/AvgPool -> shared MLP) ----------
    ch_max = jnp.max(x, axis=2)                              # (Bt, C)
    ch_avg = jnp.sum(x, axis=2) * (1.0 / HW)                 # (Bt, C)

    # Merge both shared-MLP evaluations into one matmul pair (M = 2*Bt).
    pooled = jnp.concatenate([ch_max, ch_avg], axis=0)       # (2*Bt, C)
    h = jnp.dot(pooled, w1t_ref[...],
                preferred_element_type=jnp.float32)          # (2*Bt, hid)
    h = jnp.maximum(h, 0.0)
    fc = jnp.dot(h, w2t_ref[...],
                 preferred_element_type=jnp.float32)         # (2*Bt, C)
    ch_att = jax.nn.sigmoid(fc[:Bt] + fc[Bt:])               # (Bt, C)
    x_ca = x * ch_att[:, :, None]                            # (Bt, C, HW)

    # ---------- Spatial attention (channel max/mean -> 7x7 conv -> sigmoid) ----------
    sp_max = jnp.max(x_ca, axis=1)                           # (Bt, HW)
    sp_avg = jnp.sum(x_ca, axis=1) * (1.0 / C)               # (Bt, HW)

    # Fused 7x7 "same" conv: one Toeplitz matmul on the concatenated pools.
    pooled_sp = jnp.concatenate([sp_max, sp_avg], axis=1)    # (Bt, 2*HW)
    conv = jnp.dot(pooled_sp.astype(jnp.bfloat16), mcat_ref[...],
                   preferred_element_type=jnp.float32)       # (Bt, HW)
    sp_att = jax.nn.sigmoid(conv)                            # (Bt, HW)

    o_ref[...] = (x_ca * sp_att[:, None, :]).astype(o_ref.dtype)


# --------------------------- wrapper / glue ----------------------------------
def conv_toeplitz(wk, H, W, pad):
    """Build M (HW, HW) s.t. out_flat = in_flat @ M equals a 'same' conv with wk."""
    K = wk.shape[0]
    M = np.zeros((H * W, H * W), dtype=np.float32)
    for oh in range(H):
        for ow in range(W):
            p = oh * W + ow
            for kh in range(K):
                for kw in range(K):
                    ih = oh + kh - pad
                    iw = ow + kw - pad
                    if 0 <= ih < H and 0 <= iw < W:
                        M[ih * W + iw, p] += wk[kh, kw]
    return M


def _pick_batch_tile(B):
    # Largest tile <= 8 that divides B while keeping >= 2 grid steps, so the
    # "parallel" batch axis can still be sharded across v7x's two TensorCores.
    for cand in (8, 4, 2):
        if B % cand == 0 and B // cand >= 2:
            return cand
    return 1


def cbam_pallas(x, w1, w2, m_cat, *, bt=None):
    B, C, H, W = x.shape
    HW = H * W
    hid = w1.shape[0]
    if bt is None:
        bt = _pick_batch_tile(B)
    assert B % bt == 0

    x2 = x.reshape(B, C, HW)
    w1t = jnp.asarray(w1).T          # (C, hid)  -- pre-transposed on host
    w2t = jnp.asarray(w2).T          # (hid, C)

    # TODO(synk): for large feature maps the O(HW^2) Toeplitz weights should be
    # replaced by a roll-based in-kernel conv; at HW=256 the dense bf16 form is fine.
    out = pl.pallas_call(
        cbam_kernel,
        out_shape=jax.ShapeDtypeStruct((B, C, HW), x.dtype),
        grid=(B // bt,),
        in_specs=[
            pl.BlockSpec((bt, C, HW), lambda b: (b, 0, 0)),    # x, Bt batch elems
            pl.BlockSpec((C, hid), lambda b: (0, 0)),          # fc1.weight^T
            pl.BlockSpec((hid, C), lambda b: (0, 0)),          # fc2.weight^T
            pl.BlockSpec((2 * HW, HW), lambda b: (0, 0)),      # fused conv Toeplitz (bf16)
        ],
        out_specs=pl.BlockSpec((bt, C, HW), lambda b: (b, 0, 0)),
        compiler_params=pltpu.CompilerParams(dimension_semantics=("parallel",)),
    )(x2, w1t, w2t, m_cat)
    return out.reshape(B, C, H, W)


# ------------------------- pure-JAX reference --------------------------------
def cbam_ref(x, w1, w2, wconv):
    maxp = jnp.max(x, axis=(2, 3))
    avgp = jnp.mean(x, axis=(2, 3))

    def fc(v):
        return jnp.maximum(v @ w1.T, 0.0) @ w2.T

    ch = jax.nn.sigmoid(fc(maxp) + fc(avgp))[:, :, None, None]
    x = x * ch

    sp_max = jnp.max(x, axis=1, keepdims=True)
    sp_avg = jnp.mean(x, axis=1, keepdims=True)
    pooled = jnp.concatenate([sp_max, sp_avg], axis=1)       # (B, 2, H, W)
    conv = jax.lax.conv_general_dilated(
        pooled, wconv, window_strides=(1, 1), padding=((3, 3), (3, 3)),
        dimension_numbers=("NCHW", "OIHW", "NCHW"))
    return x * jax.nn.sigmoid(conv)


# --------------------------------- main ---------------------------------------
if __name__ == "__main__":
    B, C, H, W = 8, 32, 16, 16
    ratio, ksize = 16, 7
    hid = C // ratio

    key = jax.random.PRNGKey(0)
    kx, k1, k2, k3 = jax.random.split(key, 4)

    x = jax.random.normal(kx, (B, C, H, W), dtype=jnp.float32)

    # Deterministic synthetic parameters (shapes from the PyTorch module).
    w1 = 0.2 * jax.random.normal(k1, (hid, C), dtype=jnp.float32)      # Linear(C, C//r, bias=False).weight
    w2 = 0.2 * jax.random.normal(k2, (C, hid), dtype=jnp.float32)      # Linear(C//r, C, bias=False).weight
    wconv = 0.1 * jax.random.normal(k3, (1, 2, ksize, ksize), dtype=jnp.float32)  # Conv2d(2,1,7,bias=False).weight

    wconv_np = np.asarray(wconv)
    m_max = conv_toeplitz(wconv_np[0, 0], H, W, pad=ksize // 2)   # channel 0 = max-pool map
    m_avg = conv_toeplitz(wconv_np[0, 1], H, W, pad=ksize // 2)   # channel 1 = mean-pool map
    # Fused (2*HW, HW) Toeplitz, cast to bf16 on host (accumulation stays f32 in-kernel).
    m_cat = jnp.asarray(np.vstack([m_max, m_avg]), dtype=jnp.bfloat16)

    out = cbam_pallas(x, w1, w2, m_cat)
    out = jax.block_until_ready(out)

    ref = cbam_ref(x, w1, w2, wconv)
    if not jnp.allclose(out, ref, atol=2e-2, rtol=2e-2):
        max_err = float(jnp.max(jnp.abs(out - ref)))
        raise AssertionError(f"Pallas CBAM mismatch vs reference, max abs err = {max_err}")

    print("KERNEL_OK")
</pallas_src>

<mosaic_0001>
module attributes {stable_mosaic.version = 11 : i64} {
  func.func @cbam_kernel(%arg0: i32, %arg1: memref<4x32x256xf32, #tpu.memory_space<vmem>>, %arg2: memref<32x2xf32, #tpu.memory_space<vmem>>, %arg3: memref<2x32xf32, #tpu.memory_space<vmem>>, %arg4: memref<512x256xbf16, #tpu.memory_space<vmem>>, %arg5: memref<4x32x256xf32, #tpu.memory_space<vmem>>) attributes {dimension_semantics = [#tpu.dimension_semantics<parallel>], iteration_bounds = array<i64: 2>, scalar_prefetch = 0 : i64, scratch_operands = 0 : i64, tpu.core_type = #tpu.core_type<tc>, window_params = [{transform_indices = @transform_0, window_bounds = array<i64: 4, 32, 256>}, {pipeline_mode = #tpu.pipeline_mode<synchronous>, transform_indices = @transform_1, window_bounds = array<i64: 32, 2>}, {pipeline_mode = #tpu.pipeline_mode<synchronous>, transform_indices = @transform_2, window_bounds = array<i64: 2, 32>}, {pipeline_mode = #tpu.pipeline_mode<synchronous>, transform_indices = @transform_3, window_bounds = array<i64: 512, 256>}, {transform_indices = @transform_4, window_bounds = array<i64: 4, 32, 256>}]} {
    %c0 = arith.constant 0 : index
    %c0_0 = arith.constant 0 : index
    %c0_1 = arith.constant 0 : index
    %0 = vector.load %arg1[%c0, %c0_0, %c0_1] : memref<4x32x256xf32, #tpu.memory_space<vmem>>, vector<4x32x256xf32>
    %cst = arith.constant dense<0xFF800000> : vector<4x32xf32>
    %1 = vector.multi_reduction <maximumf>, %0, %cst [2] : vector<4x32x256xf32> to vector<4x32xf32>
    %cst_2 = arith.constant dense<0.000000e+00> : vector<4x32xf32>
    %2 = vector.multi_reduction <add>, %0, %cst_2 [2] : vector<4x32x256xf32> to vector<4x32xf32>
    %cst_3 = arith.constant 3.906250e-03 : f32
    %3 = vector.broadcast %cst_3 : f32 to vector<4x32xf32>
    %4 = arith.mulf %2, %3 : vector<4x32xf32>
    %5 = tpu.concatenate %1, %4 in 0 : vector<4x32xf32>, vector<4x32xf32> -> vector<8x32xf32>
    %c0_4 = arith.constant 0 : index
    %c0_5 = arith.constant 0 : index
    %6 = vector.load %arg2[%c0_4, %c0_5] : memref<32x2xf32, #tpu.memory_space<vmem>>, vector<32x2xf32>
    %cst_6 = arith.constant dense<0.000000e+00> : vector<8x2xf32>
    %7 = tpu.matmul %5, %6, %cst_6 {dimension_numbers = #tpu.dot_dimension_numbers<[1], [0], [0], [1], [0, 0, 1, 1], [], []>} : vector<8x32xf32>, vector<32x2xf32>, vector<8x2xf32> -> vector<8x2xf32>
    %cst_7 = arith.constant 0.000000e+00 : f32
    %8 = vector.broadcast %cst_7 : f32 to vector<8x2xf32>
    %9 = arith.maximumf %7, %8 : vector<8x2xf32>
    %c0_8 = arith.constant 0 : index
    %c0_9 = arith.constant 0 : index
    %10 = vector.load %arg3[%c0_8, %c0_9] : memref<2x32xf32, #tpu.memory_space<vmem>>, vector<2x32xf32>
    %cst_10 = arith.constant dense<0.000000e+00> : vector<8x32xf32>
    %11 = tpu.matmul %9, %10, %cst_10 {dimension_numbers = #tpu.dot_dimension_numbers<[1], [0], [0], [1], [0, 0, 1, 1], [], []>} : vector<8x2xf32>, vector<2x32xf32>, vector<8x32xf32> -> vector<8x32xf32>
    %12 = vector.extract_strided_slice %11 {offsets = [0, 0], sizes = [4, 32], strides = [1, 1]} : vector<8x32xf32> to vector<4x32xf32>
    %13 = vector.extract_strided_slice %11 {offsets = [4, 0], sizes = [4, 32], strides = [1, 1]} : vector<8x32xf32> to vector<4x32xf32>
    %14 = arith.addf %12, %13 : vector<4x32xf32>
    %15 = arith.negf %14 : vector<4x32xf32>
    %16 = math.exp %15 : vector<4x32xf32>
    %cst_11 = arith.constant 1.000000e+00 : f32
    %17 = vector.broadcast %cst_11 : f32 to vector<4x32xf32>
    %18 = arith.addf %17, %16 : vector<4x32xf32>
    %19 = arith.divf %17, %18 : vector<4x32xf32>
    %20 = vector.shape_cast %19 : vector<4x32xf32> to vector<4x32x1xf32>
    %21 = vector.broadcast %20 : vector<4x32x1xf32> to vector<4x32x256xf32>
    %22 = arith.mulf %0, %21 : vector<4x32x256xf32>
    %cst_12 = arith.constant dense<0xFF800000> : vector<4x256xf32>
    %23 = vector.multi_reduction <maximumf>, %22, %cst_12 [1] : vector<4x32x256xf32> to vector<4x256xf32>
    %cst_13 = arith.constant dense<0.000000e+00> : vector<4x256xf32>
    %24 = vector.multi_reduction <add>, %22, %cst_13 [1] : vector<4x32x256xf32> to vector<4x256xf32>
    %cst_14 = arith.constant 3.125000e-02 : f32
    %25 = vector.broadcast %cst_14 : f32 to vector<4x256xf32>
    %26 = arith.mulf %24, %25 : vector<4x256xf32>
    %27 = tpu.concatenate %23, %26 in 1 : vector<4x256xf32>, vector<4x256xf32> -> vector<4x512xf32>
    %28 = arith.truncf %27 : vector<4x512xf32> to vector<4x512xbf16>
    %c0_15 = arith.constant 0 : index
    %c0_16 = arith.constant 0 : index
    %29 = vector.load %arg4[%c0_15, %c0_16] : memref<512x256xbf16, #tpu.memory_space<vmem>>, vector<512x256xbf16>
    %cst_17 = arith.constant dense<0.000000e+00> : vector<4x256xf32>
    %30 = tpu.matmul %28, %29, %cst_17 {dimension_numbers = #tpu.dot_dimension_numbers<[1], [0], [0], [1], [0, 0, 1, 1], [], []>} : vector<4x512xbf16>, vector<512x256xbf16>, vector<4x256xf32> -> vector<4x256xf32>
    %31 = arith.negf %30 : vector<4x256xf32>
    %32 = math.exp %31 : vector<4x256xf32>
    %cst_18 = arith.constant 1.000000e+00 : f32
    %33 = vector.broadcast %cst_18 : f32 to vector<4x256xf32>
    %34 = arith.addf %33, %32 : vector<4x256xf32>
    %35 = arith.divf %33, %34 : vector<4x256xf32>
    %36 = vector.shape_cast %35 : vector<4x256xf32> to vector<4x1x256xf32>
    %37 = vector.broadcast %36 : vector<4x1x256xf32> to vector<4x32x256xf32>
    %38 = arith.mulf %22, %37 : vector<4x32x256xf32>
    %c0_19 = arith.constant 0 : index
    %c0_20 = arith.constant 0 : index
    %c0_21 = arith.constant 0 : index
    %39 = vector.load %arg5[%c0_19, %c0_20, %c0_21] : memref<4x32x256xf32, #tpu.memory_space<vmem>>, vector<4x32x256xf32>
    tpu.vector_store %arg5[%c0_19, %c0_20, %c0_21], %38 {strides = array<i32>} : memref<4x32x256xf32, #tpu.memory_space<vmem>>, vector<4x32x256xf32>,
    return
  }
  func.func @transform_0(%arg0: i32) -> (i32, i32, i32) {
    %c0_i32 = arith.constant 0 : i32
    %c0_i32_0 = arith.constant 0 : i32
    %c0_i32_1 = arith.constant 0 : i32
    return %arg0, %c0_i32, %c0_i32_0 : i32, i32, i32
  }
  func.func @transform_1(%arg0: i32) -> (i32, i32) {
    %c0_i32 = arith.constant 0 : i32
    %c0_i32_0 = arith.constant 0 : i32
    %c0_i32_1 = arith.constant 0 : i32
    return %c0_i32, %c0_i32_0 : i32, i32
  }
  func.func @transform_2(%arg0: i32) -> (i32, i32) {
    %c0_i32 = arith.constant 0 : i32
    %c0_i32_0 = arith.constant 0 : i32
    %c0_i32_1 = arith.constant 0 : i32
    return %c0_i32, %c0_i32_0 : i32, i32
  }
  func.func @transform_3(%arg0: i32) -> (i32, i32) {
    %c0_i32 = arith.constant 0 : i32
    %c0_i32_0 = arith.constant 0 : i32
    %c0_i32_1 = arith.constant 0 : i32
    return %c0_i32, %c0_i32_0 : i32, i32
  }
  func.func @transform_4(%arg0: i32) -> (i32, i32, i32) {
    %c0_i32 = arith.constant 0 : i32
    %c0_i32_0 = arith.constant 0 : i32
    %c0_i32_1 = arith.constant 0 : i32
    return %arg0, %c0_i32, %c0_i32_0 : i32, i32, i32
  }
}

</mosaic_0001>

<bundles_post_ra>
// kernel: tpu_custom_call.1
= control target key start
LH: loop header
LB: loop body
LE: loop exit
PB: predicated region body
PF: predicated region fallthrough
CT: control target
= control target key end

     0   :  { %9 = vsyncpa [#allocation3], 0  ;;  %s2972_s0 = inlined_call_operand.hbm [shape: f32[8,32,256], index: 0, kind: input, shape index: {}]   ;;  %s2973_s1 = inlined_call_operand.vmem [shape: f32[32,2], index: 1, kind: input, shape index: {}]   ;;  %s2974_s2 = inlined_call_operand.vmem [shape: f32[2,32], index: 2, kind: input, shape index: {}]   ;;  %s2975_s3 = inlined_call_operand.hbm [shape: bf16[512,256], index: 3, kind: input, shape index: {}]   ;;  %s2976_s4 = inlined_call_operand.hbm [shape: f32[8,32,256], index: 4, kind: output, shape index: {}]  }
   0x1   :  { %11 = vsyncpa [#allocation3 + $0x1], 0 }
   0x2   :  { %12 = vsyncpa [#allocation6], 0 }
   0x3   :  { %13 = vsyncpa [#allocation4], 0 }
   0x4   :  { %15 = vsyncpa [#allocation4 + $0x1], 0  ;;  %s2223_s15 = smov 0   ;;  %s2225_s16 = smov 0  }
   0x5   :  { %s2227_s17 = smov 0   ;;  %s2229_s18 = smov 0  }
   0x6 LB: > { %s2244_s19 = sadd.s32 4294967295, %s2183_s18   ;;  %s1757_s20 = sadd.s32 4294967294, %s2183_s18   ;;  %s2183_s18 = sphi %s2229_s18, %s3074_s18   ;;  %s2179_s17 = sphi %s2227_s17, %s3073_s17   ;;  %s2175_s16 = sphi %s2225_s16, %s3072_s16   ;;  %s2171_s15 = sphi %s2223_s15, %s3071_s15  }
   0x7   : > { %p41_p0 = scmp.ne.s32.totalorder %s2175_s16, %s2171_s15  ;;  %p2977_p1 = scmp.eq.s32.totalorder %s2244_s19, 0 }
   0x8   : > { %p134_p3 = scmp.eq.s32.totalorder %s1757_s20, 1  ;;  %p1758_p5 = scmp.ge.s32.totalorder %s2183_s18, 1 }
   0x9   : > { %p2253_p4 = por %p2977_p1, %p41_p0  ;;  %p141_p7 = scmp.lt.s32.totalorder %s2183_s18, 3 }
   0xa   : > { %p2258_p6 = por %p134_p3, %p41_p0  ;;  %s2185_s24 = smov [#allocation5]  }
   0xb   : > { %s3006_s21 = scalar_select %p2253_p4, 1, 0 }
   0xc   : > { %s3007_s22 = scalar_select %p2258_p6, 1, 0 }
   0xd   : > { %p2263_p8 = pnand %p1758_p5, %p141_p7  ;;  %s159_s25 = sshll.u32 %s2185_s24, 4  ;;  %s2267_s25 = int_to_ptr.vmem [resolvable:$true] %s159_s25 }
   0xe   : > { %s2279_s27 = sadd.s32 1, %s2183_s18   ;;  %s28_s28 = sadd.s32 1, %s2179_s17 }
   0xf   : > { %s3008_s23 = scalar_select %p2263_p8, 1, 0 }
  0x10   : > { %p1888_p9 = pneg %p2263_p8  ;;  %s25_s29 = ssub.s32 %s2183_s18, %s2279_s27 }
  0x11   : > { %s2055_s6 = scalar_lea.hbm %s2975_s3, 8192 }
  0x12   : > { %p2274_p11 = pnand %p1888_p9, %p2977_p1  ;;  %p2056_p12 = scmp.ne.s32.totalorder %s2975_s3, %s2055_s6 }
  0x13   : > { %p2062_p5 = scmp.lt.u32.totalorder %s2055_s6, %s2975_s3 }
  0x14   : > { %p2057_p13 = pneg %p2274_p11 }
  0x16   : > { %p2058_p0 = pnand %p2057_p13, %p2056_p12 }
  0x18   : > { %p2059_p3 = pneg %p2058_p0 }
  0x1a   : > { %p2064_p7 = pnand %p2062_p5, %p2059_p3 }
  0x1c   : > { %2067 = shalt.err (!%p2064_p7)
}
  0x1d   : > { %s2068_s11 = scalar_lea.vmem %s2267_s25, 8192  ;;  %p2076_p2 = scmp.lt.s32.totalorder %s2267_s25, %s2267_s25 }
  0x1e   : > { %p2069_p9 = scmp.ne.s32.totalorder %s2267_s25, %s2068_s11  ;;  %p2077_p6 = scmp.lt.s32.totalorder %s2068_s11, %s2068_s11 }
  0x20   : > { %p2071_p10 = pnand %p2069_p9, %p2057_p13  ;;  %p2078_p4 = por %p2077_p6, %p2076_p2 }
  0x22   : > { %p2072_p1 = pneg %p2071_p10 }
  0x24   : > { %p2079_p8 = pnand %p2078_p4, %p2072_p1 }
  0x26   : > { %2082 = shalt.err (!%p2079_p8)
}
  0x27   : > { %s2186_s12 = smov 128   ;;  %s2187_s13 = smov 8  }
  0x28   : > { %1891 = dma.hbm_to_vmem [thread:$0]  (!%p2274_p11), %s2975_s3, 8192, %s2267_s25, [#allocation6], %s2186_s12, %s2186_s12, %s2187_s13  }
  0x29   : > { %p26_p2 = scmp.eq.s32.totalorder %s25_s29, 0  ;;  %p35_p1 = scmp.ne.s32.totalorder %s2179_s17, %s2175_s16 }
  0x2a   : > { %p36_p4 = scmp.eq.s32.totalorder %s2183_s18, 0  ;;  %p1901_p6 = scmp.lt.s32.totalorder %s2183_s18, 2 }
  0x2b   : > { %s2310_s24 = scalar_select %p26_p2, %s2179_s17, %s28_s28  }
  0x2c   : > { %p37_p8 = por %p36_p4, %p35_p1  ;;  %p3010_p10 = scmp.eq.s32.totalorder %s2244_s19, 1 }
  0x2d   : > { %s173_s5 = sand.u32 1, %s2179_s17   ;;  %s1846_s6 = sshll.u32 %s2183_s18, 12 }
  0x2e   : > { %p2314_p12 = por %p3010_p10, %p35_p1  ;;  %s1761_s7 = sshll.u32 %s173_s5, 8 }
  0x2f   : > { %s2323_s9 = scalar_lea.hbm %s2972_s0, %s1846_s6  ;;  %s177_s25 = scalar_lea.vmem [#allocation2], %s1761_s7 }
  0x30   : > { %s185_s28 = sshll.u32 %s177_s25, 4  ;;  %p2325_p11 = pnand %p1901_p6, %p37_p8  ;;  %s2329_s28 = int_to_ptr.vmem [resolvable:$true] %s185_s28 }
  0x31   : > { %s2331_s10 = scalar_lea.sflag [#allocation3], %s173_s5  ;;  %s2083_s11 = scalar_lea.hbm %s2323_s9, 4096 }
  0x32   : > { %p2084_p13 = scmp.ne.s32.totalorder %s2323_s9, %s2083_s11  ;;  %p2085_p0 = pneg %p2325_p11 }
  0x33   : > { %s2088_s14 = scalar_lea.hbm %s2972_s0, 8192  ;;  %p2089_p7 = scmp.lt.u32.totalorder %s2323_s9, %s2972_s0 }
  0x34   : > { %p2086_p3 = pnand %p2085_p0, %p2084_p13  ;;  %p2090_p9 = scmp.lt.u32.totalorder %s2088_s14, %s2083_s11 }
  0x35   : > { %p2092_p1 = scmp.lt.u32.totalorder %s2083_s11, %s2323_s9 }
  0x36   : > { %p2087_p5 = pneg %p2086_p3  ;;  %p2091_p2 = por %p2090_p9, %p2089_p7 }
  0x38   : > { %p2093_p4 = por %p2092_p1, %p2091_p2 }
  0x3a   : > { %p2094_p6 = pnand %p2093_p4, %p2087_p5 }
  0x3c   : > { %2097 = shalt.err (!%p2094_p6)
}
  0x3d   : > { %s2098_s5 = scalar_lea.vmem %s2329_s28, 4096  ;;  %s2188_s7 = smov [#allocation2]  }
  0x3e   : > { %p2099_p8 = scmp.ne.s32.totalorder %s2329_s28, %s2098_s5  ;;  %s2103_s26 = sshll.u32 %s2188_s7, 4  ;;  %s2104_s26 = int_to_ptr.vmem [resolvable:$false] %s2103_s26 }
  0x3f   : > { %s2105_s8 = scalar_lea.vmem %s2104_s26, 8192  ;;  %p2106_p3 = scmp.lt.s32.totalorder %s2329_s28, %s2104_s26 }
  0x40   : > { %p2101_p10 = pnand %p2099_p8, %p2085_p0  ;;  %p2107_p7 = scmp.lt.s32.totalorder %s2105_s8, %s2098_s5 }
  0x42   : > { %p2102_p13 = pneg %p2101_p10  ;;  %p2108_p9 = por %p2107_p7, %p2106_p3 }
  0x44   : > { %p2109_p2 = pnand %p2108_p9, %p2102_p13 }
  0x46   : > { %2112 = shalt.err (!%p2109_p2)
}
  0x47   : > { %s2189_s25 = smov 256   ;;  %s2190_s11 = smov 16  }
  0x48   : > { %1895 = dma.hbm_to_vmem [thread:$0]  (!%p2325_p11), %s2323_s9, 4096, %s2329_s28, %s2331_s10, %s2189_s25, %s2189_s25, %s2190_s11  }
  0x49   : > { %p3013_p0 = scmp.ne.s32.totalorder %s3008_s23, 0 }
  0x4b   : > { %197 = sbr.rel (%p3013_p0) target bundleno = 1224 (0x4c8), region = 36 }
  0x52   : > { %s2362_s12 = sand.u32 1, %s2175_s16   ;;  %p3014_p5 = scmp.ne.s32.totalorder %s3006_s21, 0 }
  0x53   : > { %s1766_s13 = sshll.u32 %s2362_s12, 8  ;;  %s200_s14 = scalar_lea.sflag [#allocation3], %s2362_s12 }
  0x54   : > { %s2368_s20 = scalar_lea.vmem [#allocation2], %s1766_s13 }
  0x55   : > { %2158 = dma.done.wait (%p3014_p5), %s200_s14, 4096  }
  0x56   : > { %2160 = vsyncadd (%p3014_p5), %s200_s14, 4294963200  ;;  %p3015_p11 = scmp.eq.s32.totalorder %s2244_s19, 0 }
  0x58   : > { %2162 = dma.done.wait (%p3015_p11), [#allocation6], 8192   ;;  %p3016_p1 = pmov %p3015_p11 }
  0x59   : > { %v2379_v0 = vld [vmem:[%s2368_s20 + $0x40] sm:$0xff]  ;;  %v2382_v1 = vld [vmem:[%s2368_s20 + $0x48] sm:$0xff]  ;;  %v2393_v5 = vld [vmem:[%s2368_s20 + $0x50] sm:$0xff]  ;;  %vm2192_vm0 = vmmov 0   ;;  %vm405_vm1 = vcmask 130112   ;;  %vm412_vm2 = vcmask 195712  }
  0x5a   : > { %2164 = vsyncadd (%p3016_p1), [#allocation6], 4294959104  ;;  %v2385_v2 = vld [vmem:[%s2368_s20] sm:$0xff]  ;;  %v326_v3 = vadd.f32 %v2382_v1, %v2379_v0  ;;  %v2390_v4 = vld [vmem:[%s2368_s20 + $0x8] sm:$0xff]  ;;  %v278_v31 = vmax.f32 %v2379_v0, %v2382_v1  ;;  %vm419_vm3 = vcmask 261312   ;;  %vm577_vm4 = vcmask 1045509  }
  0x5b   : > { %v2396_v6 = vld [vmem:[%s2368_s20 + $0x58] sm:$0xff]  ;;  %v314_v7 = vadd.f32 %v2390_v4, %v2385_v2  ;;  %v2401_v8 = vld [vmem:[%s2368_s20 + $0x10] sm:$0xff]  ;;  %v2411_v12 = vld [vmem:[%s2368_s20 + $0x60] sm:$0xff]  ;;  %v266_v25 = vmax.f32 %v2385_v2, %v2390_v4  ;;  %vm478_vm5 = vcmask 1041409   ;;  %vm480_vm6 = vcmask 1042434   ;;  %s2864_s8 = scalar_lea.vmem [#allocation7], %s1766_s13 }
  0x5c   : > { %v2404_v9 = vld [vmem:[%s2368_s20 + $0x18] sm:$0xff]  ;;  %327 = vadd.xlane.f32.xlu1 %v326_v3  ;;  %v329_v10 = vadd.f32 %v2396_v6, %v2393_v5  ;;  %v2414_v13 = vld [vmem:[%s2368_s20 + $0x68] sm:$0xff]  ;;  %v2417_v14 = vld [vmem:[%s2368_s20 + $0x20] sm:$0xff]  ;;  %v281_v28 = vmax.f32 %v2393_v5, %v2396_v6  ;;  %vm579_vm7 = vcmask 1046534   ;;  %vm581_vm8 = vcmask 1047559   ;;  %s1848_s25 = sshll.u32 %s2244_s19, 12 }
  0x5d   : > { %315 = vadd.xlane.f32.xlu0 %v314_v7  ;;  %v317_v11 = vadd.f32 %v2404_v9, %v2401_v8  ;;  %v2420_v15 = vld [vmem:[%s2368_s20 + $0x28] sm:$0xff]  ;;  %v332_v16 = vadd.f32 %v2414_v13, %v2411_v12  ;;  %v2427_v18 = vld [vmem:[%s2368_s20 + $0x90] sm:$0xff]  ;;  %v2430_v19 = vld [vmem:[%s2368_s20 + $0x98] sm:$0xff]  ;;  %v269_v24 = vmax.f32 %v2401_v8, %v2404_v9  ;;  %v284_v45 = vmax.f32 %v2411_v12, %v2414_v13  ;;  %s1674_s11 = sshll.u32 %s2864_s8, 4  ;;  %s2912_s14 = scalar_lea.hbm %s2976_s4, %s1848_s25  ;;  %s2914_s11 = int_to_ptr.vmem [resolvable:$true] %s1674_s11 }
  0x5e   : > { %v320_v17 = vadd.f32 %v2420_v15, %v2417_v14  ;;  %v2433_v20 = vld [vmem:[%s2368_s20 + $0x80] sm:$0xff]  ;;  %v2436_v21 = vld [vmem:[%s2368_s20 + $0x88] sm:$0xff]  ;;  %v341_v22 = vadd.f32 %v2430_v19, %v2427_v18  ;;  %v2447_v26 = vld [vmem:[%s2368_s20 + $0x70] sm:$0xff]  ;;  %v272_v42 = vmax.f32 %v2417_v14, %v2420_v15  ;;  %v293_v49 = vmax.f32 %v2427_v18, %v2430_v19  ;;  %s2113_s21 = scalar_lea.vmem %s2914_s11, 4096  ;;  %s2195_s23 = smov [#allocation7]  }
  0x5f   : > { %v338_v23 = vadd.f32 %v2436_v21, %v2433_v20  ;;  %v2450_v27 = vld [vmem:[%s2368_s20 + $0x78] sm:$0xff]  ;;  %v2455_v29 = vld [vmem:[%s2368_s20 + $0x30] sm:$0xff]  ;;  %v2463_v32 = vld [vmem:[%s2368_s20 + $0xc0] sm:$0xff]  ;;  %v290_v44 = vmax.f32 %v2433_v20, %v2436_v21  ;;  %vm482_vm9 = vcmask 1043459   ;;  %vm584_vm10 = vcmask 1043456   ;;  %p2114_p4 = scmp.ne.s32.totalorder %s2914_s11, %s2113_s21  ;;  %s2117_s9 = sshll.u32 %s2195_s23, 4  ;;  %s2118_s9 = int_to_ptr.vmem [resolvable:$false] %s2117_s9 }
  0x60   : > { %330 = vadd.xlane.f32.xlu1 %v329_v10  ;;  %3017 = vst [vmem:[#allocation11_spill] sm:$0xff] %v2455_v29  ;;  %v2458_v30 = vld [vmem:[%s2368_s20 + $0x38] sm:$0xff]  ;;  %v2466_v33 = vld [vmem:[%s2368_s20 + $0xc8] sm:$0xff]  ;;  %v335_v34 = vadd.f32 %v2450_v27, %v2447_v26  ;;  %v2471_v35 = vld [vmem:[%s2368_s20 + $0xa0] sm:$0xff]  ;;  %v287_v55 = vmax.f32 %v2447_v26, %v2450_v27  ;;  %vm590_vm11 = vcmask 261120   ;;  %vm670_vm12 = vcmask 1041408   ;;  %p2120_p10 = scmp.lt.s32.totalorder %s2914_s11, %s2118_s9 }
  0x61   : > { %318 = vadd.xlane.f32.xlu0 %v317_v11  ;;  %3018 = vst [vmem:[#allocation12_spill] sm:$0xff] %v2458_v30  ;;  %v2474_v36 = vld [vmem:[%s2368_s20 + $0xa8] sm:$0xff]  ;;  %v323_v37 = vadd.f32 %v2458_v30, %v2455_v29  ;;  %v350_v38 = vadd.f32 %v2466_v33, %v2463_v32  ;;  %v2481_v39 = vld [vmem:[%s2368_s20 + $0xd0] sm:$0xff]  ;;  %v2484_v40 = vld [vmem:[%s2368_s20 + $0xd8] sm:$0xff]  ;;  %v275_v52 = vmax.f32 %v2455_v29, %v2458_v30  ;;  %v2191_v11 = vmov 0.0|0.0   ;;  %p2115_p6 = pnand %p2114_p4, %p2314_p12  ;;  %s2119_s28 = scalar_lea.vmem %s2118_s9, 8192 }
  0x62   : > { %3019 = vst [vmem:[#allocation13_spill] sm:$0xff] %v2474_v36  ;;  %3020 = vst [vmem:[#allocation14_spill] sm:$0xff] %v2481_v39  ;;  %v344_v41 = vadd.f32 %v2474_v36, %v2471_v35  ;;  %v353_v43 = vadd.f32 %v2484_v40, %v2481_v39  ;;  %v2497_v46 = vld [vmem:[%s2368_s20 + $0xb0] sm:$0xff]  ;;  %v2500_v47 = vld [vmem:[%s2368_s20 + $0xb8] sm:$0xff]  ;;  %v296_v54 = vmax.f32 %v2471_v35, %v2474_v36  ;;  %1872 = vmatprep.subr.bf16.mxu0 %v2191_v11  ;;  %vm666_vm13 = vcmask 15360   ;;  %p2121_p13 = scmp.lt.s32.totalorder %s2119_s28, %s2113_s21 }
  0x63   : > { %3021 = vst [vmem:[#allocation15_spill] sm:$0xff] %v2484_v40  ;;  %3022 = vst [vmem:[#allocation16_spill] sm:$0xff] %v2497_v46  ;;  %v347_v48 = vadd.f32 %v2500_v47, %v2497_v46  ;;  %v2507_v50 = vld [vmem:[%s2368_s20 + $0xe0] sm:$0xff]  ;;  %v2510_v51 = vld [vmem:[%s2368_s20 + $0xe8] sm:$0xff]  ;;  %v305_v56 = vmax.f32 %v2481_v39, %v2484_v40  ;;  %v302_v57 = vmax.f32 %v2463_v32, %v2466_v33  ;;  %p2116_p8 = pneg %p2115_p6 }
  0x64   : > { %333 = vadd.xlane.f32.xlu1 %v332_v16  ;;  %3023 = vst [vmem:[#allocation17_spill] sm:$0xff] %v2500_v47  ;;  %3024 = vst [vmem:[#allocation18_spill] sm:$0xff] %v2507_v50  ;;  %v356_v53 = vadd.f32 %v2510_v51, %v2507_v50  ;;  %v2525_v58 = vld [vmem:[%s2368_s20 + $0xf0] sm:$0xff]  ;;  %v2528_v59 = vld [vmem:[%s2368_s20 + $0xf8] sm:$0xff]  ;;  %v299_v60 = vmax.f32 %v2497_v46, %v2500_v47  ;;  %v308_v63 = vmax.f32 %v2507_v50, %v2510_v51  ;;  %s1660_s20 = scalar_lea.sflag [#allocation4], %s2362_s12  ;;  %p2122_p3 = por %p2121_p13, %p2120_p10 }
  0x65   : > { %321 = vadd.xlane.f32.xlu0 %v320_v17  ;;  %3025 = vst [vmem:[#allocation19_spill] sm:$0xff] %v2510_v51  ;;  %3026 = vst [vmem:[#allocation20_spill] sm:$0xff] %v2525_v58  ;;  %v359_v61 = vadd.f32 %v2528_v59, %v2525_v58  ;;  %v311_v62 = vmax.f32 %v2525_v58, %v2528_v59  ;;  %v586_v3 = vld [vmem:[%s2973_s1] sm:$0xff]  ;;  %v587_v7 = vld [vmem:[%s2973_s1 + $0x8] sm:$0xff] }
  0x66   : > { %3027 = vst [vmem:[#allocation21_spill] sm:$0xff] %v2528_v59  ;;  %v1873_v10 = vpack.c.bf16 %v587_v7, %v586_v3  ;;  %v588_v16 = vld [vmem:[%s2973_s1 + $0x10] sm:$0xff]  ;;  %v589_v17 = vld [vmem:[%s2973_s1 + $0x18] sm:$0xff]  ;;  %p2123_p7 = pnand %p2122_p3, %p2116_p8 }
  0x68   : > { %342 = vadd.xlane.f32.xlu1 %v341_v22  ;;  %1874 = vmatpush3.bf16.msra.mxu0 %v1873_v10  ;;  %v1876_v22 = vpack.c.bf16 %v589_v17, %v588_v16 }
  0x69   : > { %339 = vadd.xlane.f32.xlu0 %v338_v23  ;;  %1875 = vmatprep.subr.bf16.mxu0 %v2191_v11  ;;  %v2193_v23 = vmov 0.0  }
  0x6a   : > { %1864 = vmatprep.mubr.msk.f32.mxu0 %vm2192_vm0, %v2193_v23  ;;  %1867 = vmatprep.subr.mxu1 %v2193_v23 }
  0x6b   : > { %1869 = vmatprep.mubr.msk.f32.mxu1 %vm2192_vm0, %v2193_v23 }
  0x6c   : > { %270 = vmax.xlane.f32.xlu1 %v269_v24  ;;  %1877 = vmatpush3.bf16.msra.mxu0 %v1876_v22 }
  0x6d   : > { %267 = vmax.xlane.f32.xlu0 %v266_v25 }
  0x70   : > { %282 = vmax.xlane.f32.xlu1 %v281_v28 }
  0x71   : > { %279 = vmax.xlane.f32.xlu0 %v278_v31 }
  0x74   : > { %336 = vadd.xlane.f32.xlu1 %v335_v34 }
  0x75   : > { %324 = vadd.xlane.f32.xlu0 %v323_v37 }
  0x78   : > { %351 = vadd.xlane.f32.xlu1 %v350_v38 }
  0x79   : > { %345 = vadd.xlane.f32.xlu0 %v344_v41 }
  0x7c   : > { %273 = vmax.xlane.f32.xlu1 %v272_v42 }
  0x7d   : > { %354 = vadd.xlane.f32.xlu0 %v353_v43 }
  0x80   : > { %291 = vmax.xlane.f32.xlu1 %v290_v44 }
  0x81   : > { %285 = vmax.xlane.f32.xlu0 %v284_v45 }
  0x84   : > { %348 = vadd.xlane.f32.xlu1 %v347_v48 }
  0x85   : > { %294 = vmax.xlane.f32.xlu0 %v293_v49 }
  0x88   : > { %276 = vmax.xlane.f32.xlu1 %v275_v52 }
  0x89   : > { %357 = vadd.xlane.f32.xlu0 %v356_v53 }
  0x8c   : > { %297 = vmax.xlane.f32.xlu1 %v296_v54 }
  0x8d   : > { %288 = vmax.xlane.f32.xlu0 %v287_v55  ;;  %v394_v55 = vlaneseq }
  0x90   : > { %306 = vmax.xlane.f32.xlu1 %v305_v56 }
  0x91   : > { %303 = vmax.xlane.f32.xlu0 %v302_v57 }
  0x94   : > { %300 = vmax.xlane.f32.xlu1 %v299_v60  ;;  %v395_v60 = vand.u32 127, %v394_v55 }
  0x95   : > { %360 = vadd.xlane.f32.xlu0 %v359_v61 }
  0x96   : > { %v407_v3 = vadd.s32 4294967280, %v395_v60  ;;  %v414_v17 = vadd.s32 4294967272, %v395_v60 }
  0x98   : > { %312 = vmax.xlane.f32.xlu1 %v311_v62  ;;  %v2564_v62 = vshrl.u32 %v394_v55, 7 }
  0x99   : > { %309 = vmax.xlane.f32.xlu0 %v308_v63  ;;  %v400_v63 = vadd.s32 4294967288, %v395_v60 }
  0x9a   : > { %v2569_v11 = vsub.s32 %v395_v60, %v2564_v62  ;;  %v2575_v58 = vsub.s32 %v407_v3, %v2564_v62  ;;  %v2580_v40 = vsub.s32 %v414_v17, %v2564_v62 }
  0x9b   : > { %v2572_v16 = vsub.s32 %v400_v63, %v2564_v62 }
  0xe9   : > { %v328_v24 = vpop.xlane.xlu1 %327 }
  0xea   : > { %v316_v25 = vpop.xlane.xlu0 %315  ;;  %v366_v22 = vmul.f32 0.00390625, %v328_v24 }
  0xeb   : > { %v362_v51 = vmul.f32 0.00390625, %v316_v25 }
  0xec   : > { %v523_v24 = vrot.slane %v366_v22, %v2569_v11 }
  0xed   : > { %v331_v28 = vpop.xlane.xlu1 %330  ;;  %v504_v25 = vrot.slane %v362_v51, %v2569_v11 }
  0xee   : > { %v319_v31 = vpop.xlane.xlu0 %318  ;;  %v367_v23 = vmul.f32 0.00390625, %v331_v28 }
  0xef   : > { %v363_v59 = vmul.f32 0.00390625, %v319_v31 }
  0xf0   : > { %v527_v28 = vrot.slane %v367_v23, %v2572_v16 }
  0xf1   : > { %v334_v34 = vpop.xlane.xlu1 %333  ;;  %v508_v31 = vrot.slane %v363_v59, %v2572_v16 }
  0xf2   : > { %v322_v37 = vpop.xlane.xlu0 %321  ;;  %v368_v50 = vmul.f32 0.00390625, %v334_v34  ;;  %v528_v22 = vsel %vm405_vm1, %v527_v28, %v523_v24 }
  0xf3   : > { %v364_v47 = vmul.f32 0.00390625, %v322_v37 }
  0xf4   : > { %v532_v34 = vrot.slane %v368_v50, %v2575_v58 }
  0xf5   : > { %v343_v38 = vpop.xlane.xlu1 %342  ;;  %v513_v37 = vrot.slane %v364_v47, %v2575_v58 }
  0xf6   : > { %v340_v41 = vpop.xlane.xlu0 %339  ;;  %v371_v46 = vmul.f32 0.00390625, %v343_v38 }
  0xf7   : > { %v370_v29 = vmul.f32 0.00390625, %v340_v41 }
  0xf8   : > { %v546_v38 = vrot.slane %v371_v46, %v2572_v16 }
  0xf9   : > { %v2550_v42 = vpop.xlane.xlu1 %270 }
  0xfa   : > { %v2552_v43 = vpop.xlane.xlu0 %267 }
  0xfb   : > { %v399_v17 = vrot.slane %v2552_v43, %v2569_v11  ;;  %v533_v43 = vsel %vm412_vm2, %v532_v34, %v528_v22 }
  0xfd   : > { %v2554_v44 = vpop.xlane.xlu1 %282 }
  0xfe   : > { %v2556_v45 = vpop.xlane.xlu0 %279  ;;  %v428_v59 = vrot.slane %v2554_v44, %v2572_v16 }
  0xff   : > { %v424_v51 = vrot.slane %v2556_v45, %v2569_v11 }
 0x101   : > { %v337_v48 = vpop.xlane.xlu1 %336  ;;  %v429_v24 = vsel %vm405_vm1, %v428_v59, %v424_v51 }
 0x102   : > { %v325_v49 = vpop.xlane.xlu0 %324  ;;  %v369_v63 = vmul.f32 0.00390625, %v337_v48  ;;  %v542_v48 = vrot.slane %v370_v29, %v2569_v11  ;;  %v509_v29 = vsel %vm405_vm1, %v508_v31, %v504_v25 }
 0x103   : > { %v365_v60 = vmul.f32 0.00390625, %v325_v49  ;;  %v404_v49 = vrot.slane %v2550_v42, %v2572_v16  ;;  %v514_v39 = vsel %vm412_vm2, %v513_v37, %v509_v29 }
 0x104   : > { %v537_v50 = vrot.slane %v369_v63, %v2580_v40  ;;  %v547_v63 = vsel %vm405_vm1, %v546_v38, %v542_v48 }
 0x105   : > { %v352_v52 = vpop.xlane.xlu1 %351  ;;  %v518_v47 = vrot.slane %v365_v60, %v2580_v40  ;;  %v406_v60 = vsel %vm405_vm1, %v404_v49, %v399_v17 }
 0x106   : > { %v346_v53 = vpop.xlane.xlu0 %345  ;;  %v374_v42 = vmul.f32 0.00390625, %v352_v52  ;;  %v538_v52 = vsel %vm419_vm3, %v537_v50, %v533_v43 }
 0x107   : > { %v372_v46 = vmul.f32 0.00390625, %v346_v53  ;;  %v519_v28 = vsel %vm419_vm3, %v518_v47, %v514_v39 }
 0x109   : > { %v2558_v54 = vpop.xlane.xlu1 %273  ;;  %v551_v31 = vrot.slane %v372_v46, %v2575_v58 }
 0x10a   : > { %v355_v56 = vpop.xlane.xlu0 %354  ;;  %v411_v25 = vrot.slane %v2558_v54, %v2575_v58 }
 0x10b   : > { %v375_v44 = vmul.f32 0.00390625, %v355_v56  ;;  %v561_v56 = vrot.slane %v374_v42, %v2569_v11 }
 0x10d   : > { %v2560_v57 = vpop.xlane.xlu1 %291  ;;  %v565_v37 = vrot.slane %v375_v44, %v2572_v16 }
 0x10e   : > { %v2562_v61 = vpop.xlane.xlu0 %285  ;;  %v443_v39 = vrot.slane %v2560_v57, %v2569_v11 }
 0x10f   : > { %v566_v22 = vsel %vm405_vm1, %v565_v37, %v561_v56 }
 0x111   : > { %v349_v7 = vpop.xlane.xlu1 %348 }
 0x112   : > { %v2566_v10 = vpop.xlane.xlu0 %294  ;;  %v373_v53 = vmul.f32 0.00390625, %v349_v7  ;;  %v433_v7 = vrot.slane %v2562_v61, %v2575_v58 }
 0x114   : > { %v556_v17 = vrot.slane %v373_v53, %v2580_v40  ;;  %v578_v53 = vsel %vm577_vm4, %v538_v52, %v519_v28  ;;  %v665_v52 = vld [vmem:[%s2974_s2] sm:$0x3] }
 0x115   : > { %v2577_v55 = vpop.xlane.xlu1 %276  ;;  %1868 = vmatpush3.msk.msra.mxu1 %vm670_vm12, %v665_v52  ;;  %v1988_v52 = vld [vmem:[#allocation5 + $0x164] ss:$8 sps:$4 sm:$0xff]  }
 0x116   : > { %v358_v30 = vpop.xlane.xlu0 %357  ;;  %v418_v51 = vrot.slane %v2577_v55, %v2580_v40 }
 0x117   : > { %v376_v36 = vmul.f32 0.00390625, %v358_v30  ;;  %v447_v30 = vrot.slane %v2566_v10, %v2572_v16  ;;  %v552_v10 = vsel %vm412_vm2, %v551_v31, %v547_v63 }
 0x119   : > { %v298_v3 = vpop.xlane.xlu1 %297  ;;  %v570_v54 = vrot.slane %v376_v36, %v2575_v58  ;;  %v448_v47 = vsel %vm405_vm1, %v447_v30, %v443_v39  ;;  %v1947_v39 = vld [vmem:[#allocation5] ss:$8 sps:$4 sm:$0xff]  }
 0x11a   : > { %v289_v41 = vpop.xlane.xlu0 %288  ;;  %v452_v38 = vrot.slane %v298_v3, %v2575_v58  ;;  %v413_v3 = vsel %vm412_vm2, %v411_v25, %v406_v60 }
 0x11b   : > { %v438_v48 = vrot.slane %v289_v41, %v2580_v40  ;;  %v434_v41 = vsel %vm412_vm2, %v433_v7, %v429_v24 }
 0x11c   : > { %v453_v29 = vsel %vm412_vm2, %v452_v38, %v448_v47  ;;  %v1949_v38 = vld [vmem:[#allocation5 + $0x4] ss:$8 sps:$4 sm:$0xff]  }
 0x11d   : > { %v307_v23 = vpop.xlane.xlu1 %306  ;;  %v439_v42 = vsel %vm419_vm3, %v438_v48, %v434_v41  ;;  %v1950_v48 = vld [vmem:[#allocation5 + $0x100] ss:$8 sps:$4 sm:$0xff]   ;;  %1434 = vmatprep.subr.bf16.mxu0 %v1949_v38  ;;  %v1989_v38 = vld [vmem:[#allocation5 + $0x70] ss:$8 sps:$4 sm:$0xff]  }
 0x11e   : > { %v304_v45 = vpop.xlane.xlu0 %303  ;;  %v466_v50 = vrot.slane %v307_v23, %v2572_v16  ;;  %v571_v23 = vsel %vm412_vm2, %v570_v54, %v566_v22  ;;  %v1958_v54 = vld [vmem:[#allocation5 + $0x114] ss:$8 sps:$4 sm:$0xff]  }
 0x11f   : > { %v462_v57 = vrot.slane %v304_v45, %v2569_v11  ;;  %v557_v11 = vsel %vm419_vm3, %v556_v17, %v552_v10  ;;  %v420_v45 = vsel %vm419_vm3, %v418_v51, %v413_v3  ;;  %v1955_v17 = vld [vmem:[#allocation5 + $0x14] ss:$8 sps:$4 sm:$0xff]   ;;  %v1961_v10 = vld [vmem:[#allocation5 + $0x24] ss:$8 sps:$4 sm:$0xff]  }
 0x120   : > { %v479_v24 = vsel %vm478_vm5, %v439_v42, %v420_v45  ;;  %v1964_v51 = vld [vmem:[#allocation5 + $0x124] ss:$8 sps:$4 sm:$0xff]   ;;  %v1967_v42 = vld [vmem:[#allocation5 + $0x34] ss:$8 sps:$4 sm:$0xff]  }
 0x121   : > { %v301_v34 = vpop.xlane.xlu1 %300  ;;  %v467_v63 = vsel %vm405_vm1, %v466_v50, %v462_v57  ;;  %v1959_v50 = vld [vmem:[#allocation5 + $0x20] ss:$8 sps:$4 sm:$0xff]   ;;  %v1976_v45 = vld [vmem:[#allocation5 + $0x144] ss:$8 sps:$4 sm:$0xff]  }
 0x122   : > { %v361_v49 = vpop.xlane.xlu0 %360  ;;  %v457_v61 = vrot.slane %v301_v34, %v2580_v40  ;;  %v1962_v57 = vld [vmem:[#allocation5 + $0x120] ss:$8 sps:$4 sm:$0xff]  }
 0x123   : > { %v377_v59 = vmul.f32 0.00390625, %v361_v49  ;;  %v1952_v49 = vld [vmem:[#allocation5 + $0x104] ss:$8 sps:$4 sm:$0xff]  }
 0x124   : > { %v458_v43 = vsel %vm419_vm3, %v457_v61, %v453_v29  ;;  %1475 = vmatprep.subr.bf16.mxu1 %v1952_v49  ;;  %v1953_v61 = vld [vmem:[#allocation5 + $0x10] ss:$8 sps:$4 sm:$0xff]  }
 0x125   : > { %v575_v36 = vrot.slane %v377_v59, %v2580_v40  ;;  %v313_v46 = vpop.xlane.xlu1 %312  ;;  %v481_v31 = vsel %vm480_vm6, %v458_v43, %v479_v24  ;;  %v1956_v59 = vld [vmem:[#allocation5 + $0x110] ss:$8 sps:$4 sm:$0xff]   ;;  %v1971_v43 = vld [vmem:[#allocation5 + $0x40] ss:$8 sps:$4 sm:$0xff]   ;;  %v1982_v24 = vld [vmem:[#allocation5 + $0x154] ss:$8 sps:$4 sm:$0xff]  }
 0x126   : > { %v310_v55 = vpop.xlane.xlu0 %309  ;;  %v476_v16 = vrot.slane %v313_v46, %v2580_v40  ;;  %v1992_v49 = vld [vmem:[#allocation5 + $0x170] ss:$8 sps:$4 sm:$0xff]  }
 0x127   : > { %v471_v44 = vrot.slane %v310_v55, %v2575_v58  ;;  %v576_v60 = vsel %vm419_vm3, %v575_v36, %v571_v23  ;;  %v580_v58 = vsel %vm579_vm7, %v557_v11, %v578_v53  ;;  %v1965_v55 = vld [vmem:[#allocation5 + $0x30] ss:$8 sps:$4 sm:$0xff]   ;;  %v1973_v23 = vld [vmem:[#allocation5 + $0x44] ss:$8 sps:$4 sm:$0xff]  }
 0x128   : > { %v582_v7 = vsel %vm581_vm8, %v576_v60, %v580_v58  ;;  %v1968_v11 = vld [vmem:[#allocation5 + $0x130] ss:$8 sps:$4 sm:$0xff]   ;;  %v1979_v60 = vld [vmem:[#allocation5 + $0x54] ss:$8 sps:$4 sm:$0xff]   ;;  %v2661_v58 = vsub.s32 1, %v2564_v62 }
 0x129   : > { %v472_v40 = vsel %vm412_vm2, %v471_v44, %v467_v63  ;;  %v1974_v44 = vld [vmem:[#allocation5 + $0x140] ss:$8 sps:$4 sm:$0xff]   ;;  %v2657_v63 = vsub.s32 0, %v2564_v62  ;;  %v1977_v53 = vld [vmem:[#allocation5 + $0x50] ss:$8 sps:$4 sm:$0xff]  }
 0x12a   : > { %v477_v56 = vsel %vm419_vm3, %v476_v16, %v472_v40  ;;  %v1970_v16 = vld [vmem:[#allocation5 + $0x134] ss:$8 sps:$4 sm:$0xff]  }
 0x12b   : > { %v483_v25 = vsel %vm482_vm9, %v477_v56, %v481_v31  ;;  %v1980_v31 = vld [vmem:[#allocation5 + $0x150] ss:$8 sps:$4 sm:$0xff]  }
 0x12c   : > { %v585_v30 = vsel %vm584_vm10, %v483_v25, %v582_v7  ;;  %v794_v25 = vsub.s32 2, %v2564_v62  ;;  %v1985_v7 = vld [vmem:[#allocation5 + $0x64] ss:$8 sps:$4 sm:$0xff]  }
 0x12d   : > { %1865 = vmatmul.mubr.msk.f32.vlgmr.msra.gmra.mrb[0].mxu0 %vm590_vm11, %v585_v30  ;;  %v1983_v30 = vld [vmem:[#allocation5 + $0x60] ss:$8 sps:$4 sm:$0xff]  }
 0x12e   : > { %1435 = vmatpush1.bf16.msra.mxu0 %v1947_v39  ;;  %v1991_v39 = vld [vmem:[#allocation5 + $0x74] ss:$8 sps:$4 sm:$0xff]  }
 0x12f   : > { %1436 = vmatprep.subr.bf16.mxu0 %v1955_v17  ;;  %v813_v17 = vsub.s32 3, %v2564_v62 }
 0x132   : > { %1437 = vmatpush1.bf16.msra.mxu0 %v1953_v61  ;;  %v1995_v61 = vld [vmem:[#allocation5 + $0x80] ss:$8 sps:$4 sm:$0xff]  }
 0x133   : > { %1438 = vmatprep.subr.bf16.mxu0 %v1961_v10  ;;  %v1998_v10 = vld [vmem:[#allocation5 + $0x180] ss:$8 sps:$4 sm:$0xff]  }
 0x136   : > { %1439 = vmatpush1.bf16.msra.mxu0 %v1959_v50  ;;  %v2003_v50 = vld [vmem:[#allocation5 + $0x94] ss:$8 sps:$4 sm:$0xff]  }
 0x137   : > { %1440 = vmatprep.subr.bf16.mxu0 %v1967_v42  ;;  %v2013_v42 = vld [vmem:[#allocation5 + $0xb0] ss:$8 sps:$4 sm:$0xff]  }
 0x13a   : > { %1441 = vmatpush1.bf16.msra.mxu0 %v1965_v55  ;;  %v2018_v55 = vld [vmem:[#allocation5 + $0x1b4] ss:$8 sps:$4 sm:$0xff]  }
 0x13b   : > { %1442 = vmatprep.subr.bf16.mxu0 %v1973_v23  ;;  %v2019_v23 = vld [vmem:[#allocation5 + $0xc0] ss:$8 sps:$4 sm:$0xff]  }
 0x13e   : > { %1443 = vmatpush1.bf16.msra.mxu0 %v1971_v43  ;;  %v2024_v43 = vld [vmem:[#allocation5 + $0x1c4] ss:$8 sps:$4 sm:$0xff]  }
 0x13f   : > { %1444 = vmatprep.subr.bf16.mxu0 %v1979_v60  ;;  %v2025_v60 = vld [vmem:[#allocation5 + $0xd0] ss:$8 sps:$4 sm:$0xff]  }
 0x142   : > { %1445 = vmatpush1.bf16.msra.mxu0 %v1977_v53  ;;  %v2030_v53 = vld [vmem:[#allocation5 + $0x1d4] ss:$8 sps:$4 sm:$0xff]  }
 0x143   : > { %1446 = vmatprep.subr.bf16.mxu0 %v1985_v7  ;;  %v2039_v7 = vld [vmem:[#allocation5 + $0xf4] ss:$8 sps:$4 sm:$0xff]  }
 0x146   : > { %1447 = vmatpush1.bf16.msra.mxu0 %v1983_v30  ;;  %v2037_v30 = vld [vmem:[#allocation5 + $0xf0] ss:$8 sps:$4 sm:$0xff]  }
 0x147   : > { %1448 = vmatprep.subr.bf16.mxu0 %v1991_v39 }
 0x14a   : > { %1449 = vmatpush1.bf16.msra.mxu0 %v1989_v38 }
 0x200   : > { %v660_v28 = vpop.f32.mrb[0].mxu0 }
 0x201   : > { %v664_v34 = vmax.f32 %v660_v28, 0.0  ;;  %v1866_v37 = vpop.f32.mrb[1].mxu0  ;;  %v1986_v28 = vld [vmem:[#allocation5 + $0x160] ss:$8 sps:$4 sm:$0xff]  }
 0x203   : > { %1870 = vmatmul.mubr.msk.f32.vlgmr.msra.gmra.mrb[0].mxu1 %vm666_vm13, %v664_v34 }
 0x204   : > { %1476 = vmatpush1.bf16.msra.mxu1 %v1950_v48  ;;  %v1994_v48 = vld [vmem:[#allocation5 + $0x174] ss:$8 sps:$4 sm:$0xff]  }
 0x205   : > { %1477 = vmatprep.subr.bf16.mxu1 %v1958_v54  ;;  %v1997_v54 = vld [vmem:[#allocation5 + $0x84] ss:$8 sps:$4 sm:$0xff]  }
 0x206   : > { %1450 = vmatprep.subr.bf16.mxu0 %v1997_v54 }
 0x207   : > { %1451 = vmatpush1.bf16.msra.mxu0 %v1995_v61 }
 0x208   : > { %1478 = vmatpush1.bf16.msra.mxu1 %v1956_v59  ;;  %v2000_v59 = vld [vmem:[#allocation5 + $0x184] ss:$8 sps:$4 sm:$0xff]   ;;  %1452 = vmatprep.subr.bf16.mxu0 %v2003_v50 }
 0x209   : > { %1479 = vmatprep.subr.bf16.mxu1 %v1964_v51 }
 0x20c   : > { %1480 = vmatpush1.bf16.msra.mxu1 %v1962_v57  ;;  %v2001_v57 = vld [vmem:[#allocation5 + $0x90] ss:$8 sps:$4 sm:$0xff]  }
 0x20d   : > { %1481 = vmatprep.subr.bf16.mxu1 %v1970_v16  ;;  %1453 = vmatpush1.bf16.msra.mxu0 %v2001_v57  ;;  %v2016_v16 = vld [vmem:[#allocation5 + $0x1b0] ss:$8 sps:$4 sm:$0xff]  }
 0x210   : > { %1482 = vmatpush1.bf16.msra.mxu1 %v1968_v11  ;;  %v2021_v11 = vld [vmem:[#allocation5 + $0xc4] ss:$8 sps:$4 sm:$0xff]  }
 0x211   : > { %1483 = vmatprep.subr.bf16.mxu1 %v1976_v45  ;;  %v2027_v45 = vld [vmem:[#allocation5 + $0xd4] ss:$8 sps:$4 sm:$0xff]  }
 0x214   : > { %1484 = vmatpush1.bf16.msra.mxu1 %v1974_v44  ;;  %v2022_v44 = vld [vmem:[#allocation5 + $0x1c0] ss:$8 sps:$4 sm:$0xff]  }
 0x215   : > { %1485 = vmatprep.subr.bf16.mxu1 %v1982_v24  ;;  %v2028_v24 = vld [vmem:[#allocation5 + $0x1d0] ss:$8 sps:$4 sm:$0xff]  }
 0x218   : > { %1486 = vmatpush1.bf16.msra.mxu1 %v1980_v31  ;;  %v2031_v31 = vld [vmem:[#allocation5 + $0xe0] ss:$8 sps:$4 sm:$0xff]  }
 0x219   : > { %1487 = vmatprep.subr.bf16.mxu1 %v1988_v52  ;;  %v2040_v52 = vld [vmem:[#allocation5 + $0x1f0] ss:$8 sps:$4 sm:$0xff]  }
 0x21c   : > { %1488 = vmatpush1.bf16.msra.mxu1 %v1986_v28  ;;  %v2042_v28 = vld [vmem:[#allocation5 + $0x1f4] ss:$8 sps:$4 sm:$0xff]  }
 0x21d   : > { %1489 = vmatprep.subr.bf16.mxu1 %v1994_v48 }
 0x220   : > { %1490 = vmatpush1.bf16.msra.mxu1 %v1992_v49 }
 0x221   : > { %1491 = vmatprep.subr.bf16.mxu1 %v2000_v59 }
 0x224   : > { %1492 = vmatpush1.bf16.msra.mxu1 %v1998_v10 }
 0x2d6   : > { %v740_v3 = vpop.f32.mrb[0].mxu1 }
 0x2d7   : > { %v745_v41 = vrot.slane %v740_v3, 4  ;;  %v1871_v47 = vpop.f32.mrb[1].mxu1 }
 0x2d8   : > { %v2009_v47 = vld [vmem:[#allocation5 + $0xa4] ss:$8 sps:$4 sm:$0xff]  }
 0x2d9   : > { %v747_v36 = vadd.f32 %v745_v41, %v740_v3  ;;  %v2006_v3 = vld [vmem:[#allocation5 + $0x194] ss:$8 sps:$4 sm:$0xff]   ;;  %v2004_v41 = vld [vmem:[#allocation5 + $0x190] ss:$8 sps:$4 sm:$0xff]   ;;  %1454 = vmatprep.subr.bf16.mxu0 %v2009_v47 }
 0x2da   : > { %1493 = vmatprep.subr.bf16.mxu1 %v2006_v3 }
 0x2db   : > { %v1772_v46 = vmul.f32 -1.442695, %v747_v36  ;;  %1494 = vmatpush1.bf16.msra.mxu1 %v2004_v41  ;;  %v2007_v36 = vld [vmem:[#allocation5 + $0xa0] ss:$8 sps:$4 sm:$0xff]  }
 0x2dc   : > { %1455 = vmatpush1.bf16.msra.mxu0 %v2007_v36 }
 0x2dd   : > { %2043 = vpow2.f32 %v1772_v46  ;;  %v2012_v46 = vld [vmem:[#allocation5 + $0x1a4] ss:$8 sps:$4 sm:$0xff]  }
 0x2de   : > { %1495 = vmatprep.subr.bf16.mxu1 %v2012_v46 }
 0x2e7   : > { %v2044_v22 = vpop.eup %2043 }
 0x2e8   : > { %v751_v29 = vadd.f32 1.0, %v2044_v22  ;;  %v2010_v22 = vld [vmem:[#allocation5 + $0x1a0] ss:$8 sps:$4 sm:$0xff]  }
 0x2e9   : > { %1496 = vmatpush1.bf16.msra.mxu1 %v2010_v22 }
 0x2ea   : > { %2045 = vrcp.f32 %v751_v29  ;;  %v2015_v29 = vld [vmem:[#allocation5 + $0xb4] ss:$8 sps:$4 sm:$0xff]   ;;  %1497 = vmatprep.subr.bf16.mxu1 %v2018_v55 }
 0x2eb   : > { %1456 = vmatprep.subr.bf16.mxu0 %v2015_v29 }
 0x2ec   : > { %1457 = vmatpush1.bf16.msra.mxu0 %v2013_v42 }
 0x2ed   : > { %1498 = vmatpush1.bf16.msra.mxu1 %v2016_v16  ;;  %1458 = vmatprep.subr.bf16.mxu0 %v2021_v11 }
 0x2ee   : > { %1499 = vmatprep.subr.bf16.mxu1 %v2024_v43 }
 0x2f0   : > { %1459 = vmatpush1.bf16.msra.mxu0 %v2019_v23 }
 0x2f1   : > { %1500 = vmatpush1.bf16.msra.mxu1 %v2022_v44  ;;  %1460 = vmatprep.subr.bf16.mxu0 %v2027_v45 }
 0x2f2   : > { %1501 = vmatprep.subr.bf16.mxu1 %v2030_v53 }
 0x2f4   : > { %v2046_v40 = vpop.eup %2045  ;;  %1461 = vmatpush1.bf16.msra.mxu0 %v2025_v60 }
 0x2f5   : > { %v757_v56 = vrot.slane %v2046_v40, %v2657_v63  ;;  %v776_v34 = vrot.slane %v2046_v40, %v2661_v58  ;;  %v795_v37 = vrot.slane %v2046_v40, %v794_v25  ;;  %v814_v51 = vrot.slane %v2046_v40, %v813_v17  ;;  %v2033_v40 = vld [vmem:[#allocation5 + $0xe4] ss:$8 sps:$4 sm:$0xff]   ;;  %1502 = vmatpush1.bf16.msra.mxu1 %v2028_v24  ;;  %v2034_v25 = vld [vmem:[#allocation5 + $0x1e0] ss:$8 sps:$4 sm:$0xff]  }
 0x2f6   : > { %1462 = vmatprep.subr.bf16.mxu0 %v2033_v40 }
 0x2f7   : > { %763 = vbcast.lane.b32.xlu1 %v757_v56, 264  ;;  %759 = vbcast.lane.b32.xlu0 %v757_v56, 256 }
 0x2f8   : > { %1463 = vmatpush1.bf16.msra.mxu0 %v2031_v31 }
 0x2f9   : > { %1464 = vmatprep.subr.bf16.mxu0 %v2039_v7 }
 0x2fb   : > { %778 = vbcast.lane.b32.xlu1 %v776_v34, 256  ;;  %797 = vbcast.lane.b32.xlu0 %v795_v37, 256 }
 0x2fc   : > { %1465 = vmatpush1.bf16.msra.mxu0 %v2037_v30 }
 0x2ff   : > { %782 = vbcast.lane.b32.xlu1 %v776_v34, 264  ;;  %767 = vbcast.lane.b32.xlu0 %v757_v56, 272 }
 0x303   : > { %801 = vbcast.lane.b32.xlu1 %v795_v37, 264  ;;  %816 = vbcast.lane.b32.xlu0 %v814_v51, 256 }
 0x307   : > { %786 = vbcast.lane.b32.xlu1 %v776_v34, 272  ;;  %805 = vbcast.lane.b32.xlu0 %v795_v37, 272 }
 0x30b   : > { %820 = vbcast.lane.b32.xlu1 %v814_v51, 264  ;;  %790 = vbcast.lane.b32.xlu0 %v776_v34, 280 }
 0x30f   : > { %771 = vbcast.lane.b32.xlu1 %v757_v56, 280  ;;  %809 = vbcast.lane.b32.xlu0 %v795_v37, 280  ;;  %v2036_v56 = vld [vmem:[#allocation5 + $0x1e4] ss:$8 sps:$4 sm:$0xff]  }
 0x310   : > { %1503 = vmatprep.subr.bf16.mxu1 %v2036_v56  ;;  %v3035_v56 = vld [vmem:[#allocation13_spill] sm:$0xff] }
 0x311   : > { %1504 = vmatpush1.bf16.msra.mxu1 %v2034_v25 }
 0x312   : > { %1505 = vmatprep.subr.bf16.mxu1 %v2042_v28 }
 0x313   : > { %824 = vbcast.lane.b32.xlu1 %v814_v51, 272 }
 0x315   : > { %1506 = vmatpush1.bf16.msra.mxu1 %v2040_v52 }
 0x317   : > { %828 = vbcast.lane.b32.xlu1 %v814_v51, 280 }
 0x369   : > { %v764_v34 = vpop.permute.xlu1 %763  ;;  %v760_v37 = vpop.permute.xlu0 %759 }
 0x36a   : > { %v2667_v17 = vmul.f32 %v764_v34, %v2401_v8  ;;  %v2670_v54 = vmul.f32 %v764_v34, %v2404_v9  ;;  %v2673_v61 = vmul.f32 %v760_v37, %v2385_v2  ;;  %v2676_v59 = vmul.f32 %v760_v37, %v2390_v4  ;;  %v3037_v34 = vld [vmem:[#allocation14_spill] sm:$0xff] }
 0x36c   : > { %v862_v8 = vmax.f32 %v2673_v61, %v2667_v17  ;;  %v871_v9 = vmax.f32 %v2676_v59, %v2670_v54  ;;  %v934_v3 = vadd.f32 %v2667_v17, %v2673_v61 }
 0x36d   : > { %v779_v39 = vpop.permute.xlu1 %778  ;;  %v798_v38 = vpop.permute.xlu0 %797 }
 0x36e   : > { %v2702_v41 = vmul.f32 %v779_v39, %v2382_v1 }
 0x371   : > { %v783_v48 = vpop.permute.xlu1 %782  ;;  %v768_v49 = vpop.permute.xlu0 %767 }
 0x372   : > { %v2679_v50 = vmul.f32 %v783_v48, %v2393_v5  ;;  %v2682_v57 = vmul.f32 %v783_v48, %v2396_v6  ;;  %v2689_v2 = vmul.f32 %v768_v49, %v2417_v14  ;;  %v2692_v4 = vmul.f32 %v768_v49, %v2420_v15  ;;  %v3042_v49 = vld [vmem:[#allocation12_spill] sm:$0xff] }
 0x373   : > { %v943_v5 = vadd.f32 %v2670_v54, %v2676_v59  ;;  %v2699_v6 = vmul.f32 %v779_v39, %v2379_v0  ;;  %v2705_v14 = vmul.f32 %v798_v38, %v2433_v20  ;;  %v2708_v15 = vmul.f32 %v798_v38, %v2436_v21  ;;  %v3039_v39 = vld [vmem:[#allocation15_spill] sm:$0xff] }
 0x374   : > { %v889_v1 = vmax.f32 %v2702_v41, %v2682_v57  ;;  %v872_v42 = vmax.f32 %v871_v9, %v2692_v4  ;;  %v935_v55 = vadd.f32 %v934_v3, %v2689_v2 }
 0x375   : > { %v802_v10 = vpop.permute.xlu1 %801  ;;  %v817_v51 = vpop.permute.xlu0 %816  ;;  %3028 = vst [vmem:[#allocation22_spill] sm:$0xff] %v2705_v14  ;;  %3029 = vst [vmem:[#allocation23_spill] sm:$0xff] %v2708_v15  ;;  %v880_v0 = vmax.f32 %v2699_v6, %v2679_v50  ;;  %v952_v21 = vadd.f32 %v2679_v50, %v2699_v6  ;;  %v944_v16 = vadd.f32 %v943_v5, %v2692_v4 }
 0x376   : > { %v2711_v46 = vmul.f32 %v802_v10, %v2427_v18  ;;  %v2714_v22 = vmul.f32 %v802_v10, %v2430_v19  ;;  %v961_v18 = vadd.f32 %v2682_v57, %v2702_v41  ;;  %v863_v19 = vmax.f32 %v862_v8, %v2689_v2 }
 0x378   : > { %3030 = vst [vmem:[#allocation24_spill] sm:$0xff] %v2711_v46  ;;  %3031 = vst [vmem:[#allocation25_spill] sm:$0xff] %v2714_v22  ;;  %v898_v43 = vmax.f32 %v2705_v14, %v2711_v46  ;;  %v907_v44 = vmax.f32 %v2708_v15, %v2714_v22  ;;  %v970_v40 = vadd.f32 %v2711_v46, %v2705_v14 }
 0x379   : > { %v787_v47 = vpop.permute.xlu1 %786  ;;  %v806_v36 = vpop.permute.xlu0 %805  ;;  %v979_v31 = vadd.f32 %v2714_v22, %v2708_v15 }
 0x37a   : > { %v2721_v29 = vmul.f32 %v787_v47, %v2411_v12  ;;  %v2724_v20 = vmul.f32 %v787_v47, %v2414_v13  ;;  %v2735_v12 = vmul.f32 %v817_v51, %v2463_v32  ;;  %v2738_v13 = vmul.f32 %v817_v51, %v2466_v33 }
 0x37c   : > { %3032 = vst [vmem:[#allocation26_spill] sm:$0xff] %v2735_v12  ;;  %3033 = vst [vmem:[#allocation27_spill] sm:$0xff] %v2738_v13  ;;  %v881_v32 = vmax.f32 %v880_v0, %v2721_v29  ;;  %v890_v53 = vmax.f32 %v889_v1, %v2724_v20  ;;  %v953_v33 = vadd.f32 %v952_v21, %v2721_v29 }
 0x37d   : > { %v821_v11 = vpop.permute.xlu1 %820  ;;  %v791_v23 = vpop.permute.xlu0 %790  ;;  %v962_v24 = vadd.f32 %v961_v18, %v2724_v20 }
 0x37e   : > { %v2745_v45 = vmul.f32 %v791_v23, %v2447_v26  ;;  %v2748_v60 = vmul.f32 %v791_v23, %v2450_v27  ;;  %v2759_v26 = vmul.f32 %v806_v36, %v2471_v35  ;;  %v2762_v27 = vmul.f32 %v806_v36, %v3035_v56  ;;  %v3041_v35 = vld [vmem:[#allocation11_spill] sm:$0xff] }
 0x37f   : > { %v2769_v37 = vmul.f32 %v821_v11, %v3037_v34  ;;  %v2772_v38 = vmul.f32 %v821_v11, %v3039_v39 }
 0x380   : > { %3034 = vst [vmem:[#allocation28_spill] sm:$0xff] %v2759_v26  ;;  %3036 = vst [vmem:[#allocation13_spill] sm:$0xff] %v2762_v27  ;;  %v882_v25 = vmax.f32 %v881_v32, %v2745_v45  ;;  %v891_v7 = vmax.f32 %v890_v53, %v2748_v60  ;;  %v954_v30 = vadd.f32 %v953_v33, %v2745_v45 }
 0x381   : > { %v963_v52 = vadd.f32 %v962_v24, %v2748_v60  ;;  %v772_v28 = vpop.permute.xlu1 %771  ;;  %3038 = vst [vmem:[#allocation14_spill] sm:$0xff] %v2769_v37  ;;  %3040 = vst [vmem:[#allocation15_spill] sm:$0xff] %v2772_v38 }
 0x382   : > { %v2775_v48 = vmul.f32 %v772_v28, %v3041_v35  ;;  %v2778_v10 = vmul.f32 %v772_v28, %v3042_v49  ;;  %v883_v51 = vrot.slane %v882_v25, 4  ;;  %v892_v8 = vrot.slane %v891_v7, 4  ;;  %v810_v49 = vpop.permute.xlu0 %809 }
 0x383   : > { %v955_v9 = vrot.slane %v954_v30, 4  ;;  %v964_v3 = vrot.slane %v963_v52, 4 }
 0x384   : > { %v864_v5 = vmax.f32 %v863_v19, %v2775_v48  ;;  %v873_v47 = vmax.f32 %v872_v42, %v2778_v10  ;;  %v936_v36 = vadd.f32 %v935_v55, %v2775_v48  ;;  %v945_v0 = vadd.f32 %v944_v16, %v2778_v10 }
 0x385   : > { %v884_v1 = vmax.f32 %v882_v25, %v883_v51  ;;  %v893_v21 = vmax.f32 %v891_v7, %v892_v8  ;;  %v956_v18 = vadd.f32 %v955_v9, %v954_v30  ;;  %v965_v11 = vadd.f32 %v964_v3, %v963_v52  ;;  %v3043_v3 = vld [vmem:[#allocation16_spill] sm:$0xff] }
 0x386   : > { %v865_v23 = vrot.slane %v864_v5, 4  ;;  %v874_v32 = vrot.slane %v873_v47, 4  ;;  %v937_v53 = vrot.slane %v936_v36, 4  ;;  %v946_v33 = vrot.slane %v945_v0, 4 }
 0x387   : > { %v885_v24 = vrot.slane %v884_v1, 2  ;;  %v894_v56 = vrot.slane %v893_v21, 2  ;;  %v957_v28 = vrot.slane %v956_v18, 2  ;;  %v966_v34 = vrot.slane %v965_v11, 2 }
 0x388   : > { %v866_v39 = vmax.f32 %v864_v5, %v865_v23  ;;  %v875_v19 = vmax.f32 %v873_v47, %v874_v32  ;;  %v938_v35 = vadd.f32 %v937_v53, %v936_v36  ;;  %v947_v42 = vadd.f32 %v946_v33, %v945_v0  ;;  %v3045_v5 = vld [vmem:[#allocation17_spill] sm:$0xff]  ;;  %v825_v23 = vpop.permute.xlu1 %824 }
 0x389   : > { %v886_v55 = vmax.f32 %v884_v1, %v885_v24  ;;  %v895_v22 = vmax.f32 %v893_v21, %v894_v56  ;;  %v958_v16 = vadd.f32 %v957_v28, %v956_v18  ;;  %v967_v25 = vadd.f32 %v966_v34, %v965_v11 }
 0x38a   : > { %v899_v7 = vmax.f32 %v898_v43, %v2759_v26  ;;  %v908_v30 = vmax.f32 %v907_v44, %v2762_v27  ;;  %v867_v52 = vrot.slane %v866_v39, 2  ;;  %v876_v51 = vrot.slane %v875_v19, 2 }
 0x38b   : > { %v939_v8 = vrot.slane %v938_v35, 2  ;;  %v948_v9 = vrot.slane %v947_v42, 2  ;;  %v2787_v46 = vmul.f32 %v810_v49, %v3043_v3  ;;  %v2790_v47 = vmul.f32 %v810_v49, %v3045_v5 }
 0x38c   : > { %v887_v36 = vrot.slane %v886_v55, 1  ;;  %v896_v0 = vrot.slane %v895_v22, 1  ;;  %v959_v1 = vrot.slane %v958_v16, 1  ;;  %v968_v21 = vrot.slane %v967_v25, 1 }
 0x38d   : > { %3044 = vst [vmem:[#allocation11_spill] sm:$0xff] %v2787_v46  ;;  %3046 = vst [vmem:[#allocation12_spill] sm:$0xff] %v2790_v47  ;;  %v971_v18 = vadd.f32 %v970_v40, %v2759_v26  ;;  %v980_v43 = vadd.f32 %v979_v31, %v2762_v27  ;;  %v916_v44 = vmax.f32 %v2735_v12, %v2769_v37 }
 0x38e   : > { %v925_v11 = vmax.f32 %v2738_v13, %v2772_v38  ;;  %v988_v32 = vadd.f32 %v2769_v37, %v2735_v12  ;;  %v997_v53 = vadd.f32 %v2772_v38, %v2738_v13  ;;  %v868_v33 = vmax.f32 %v866_v39, %v867_v52 }
 0x38f   : > { %v877_v24 = vmax.f32 %v875_v19, %v876_v51  ;;  %v940_v56 = vadd.f32 %v939_v8, %v938_v35  ;;  %v949_v28 = vadd.f32 %v948_v9, %v947_v42  ;;  %v900_v40 = vmax.f32 %v899_v7, %v2787_v46  ;;  %v3047_v35 = vld [vmem:[#allocation18_spill] sm:$0xff]  ;;  %v3049_v7 = vld [vmem:[#allocation19_spill] sm:$0xff] }
 0x390   : > { %v909_v31 = vmax.f32 %v908_v30, %v2790_v47  ;;  %v2804_v34 = vmax.f32 %v886_v55, %v887_v36  ;;  %v2806_v49 = vmax.f32 %v895_v22, %v896_v0  ;;  %v960_v3 = vadd.f32 %v959_v1, %v958_v16  ;;  %v829_v16 = vpop.permute.xlu1 %828 }
 0x391   : > { %v969_v5 = vadd.f32 %v968_v21, %v967_v25  ;;  %v901_v27 = vrot.slane %v900_v40, 4  ;;  %v972_v37 = vadd.f32 %v971_v18, %v2787_v46  ;;  %v981_v38 = vadd.f32 %v980_v43, %v2790_v47 }
 0x392   : > { %v910_v26 = vrot.slane %v909_v31, 4  ;;  %v869_v39 = vrot.slane %v868_v33, 1  ;;  %v878_v19 = vrot.slane %v877_v24, 1  ;;  %v2811_v42 = vmul.f32 %v825_v23, %v3047_v35  ;;  %v3051_v35 = vld [vmem:[#allocation20_spill] sm:$0xff] }
 0x393   : > { %v2814_v52 = vmul.f32 %v825_v23, %v3049_v7  ;;  %v902_v55 = vmax.f32 %v900_v40, %v901_v27  ;;  %v973_v22 = vrot.slane %v972_v37, 4  ;;  %v982_v51 = vrot.slane %v981_v38, 4 }
 0x394   : > { %3048 = vst [vmem:[#allocation16_spill] sm:$0xff] %v2811_v42  ;;  %v911_v30 = vmax.f32 %v909_v31, %v910_v26  ;;  %v941_v25 = vrot.slane %v940_v56, 1  ;;  %v950_v8 = vrot.slane %v949_v28, 1  ;;  %v917_v9 = vmax.f32 %v916_v44, %v2811_v42  ;;  %v3053_v26 = vld [vmem:[#allocation21_spill] sm:$0xff] }
 0x395   : > { %3050 = vst [vmem:[#allocation17_spill] sm:$0xff] %v2814_v52  ;;  %v926_v36 = vmax.f32 %v925_v11, %v2814_v52  ;;  %v903_v0 = vrot.slane %v902_v55, 2  ;;  %v974_v21 = vadd.f32 %v973_v22, %v972_v37  ;;  %v983_v18 = vadd.f32 %v982_v51, %v981_v38 }
 0x396   : > { %v912_v1 = vrot.slane %v911_v30, 2  ;;  %v989_v43 = vadd.f32 %v988_v32, %v2811_v42  ;;  %v998_v23 = vadd.f32 %v997_v53, %v2814_v52  ;;  %v2821_v27 = vmul.f32 %v829_v16, %v3051_v35 }
 0x397   : > { %v2824_v40 = vmul.f32 %v829_v16, %v3053_v26  ;;  %v1008_v31 = vmul.f32 0.03125, %v960_v3  ;;  %v1009_v7 = vmul.f32 0.03125, %v969_v5  ;;  %v975_v13 = vrot.slane %v974_v21, 2 }
 0x398   : > { %3052 = vst [vmem:[#allocation18_spill] sm:$0xff] %v2821_v27  ;;  %v984_v44 = vrot.slane %v983_v18, 2  ;;  %v918_v11 = vmax.f32 %v917_v9, %v2821_v27  ;;  %v990_v37 = vadd.f32 %v989_v43, %v2821_v27  ;;  %v904_v32 = vmax.f32 %v902_v55, %v903_v0 }
 0x399   : > { %v927_v12 = vmax.f32 %v926_v36, %v2824_v40  ;;  %v999_v38 = vadd.f32 %v998_v23, %v2824_v40  ;;  %v913_v53 = vmax.f32 %v911_v30, %v912_v1  ;;  %v976_v22 = vadd.f32 %v975_v13, %v974_v21 }
 0x39a   : > { %v985_v51 = vadd.f32 %v984_v44, %v983_v18  ;;  %v919_v35 = vrot.slane %v918_v11, 4  ;;  %v991_v16 = vrot.slane %v990_v37, 4  ;;  %v942_v3 = vadd.f32 %v941_v25, %v940_v56 }
 0x39b   : > { %v928_v52 = vrot.slane %v927_v12, 4  ;;  %v1000_v26 = vrot.slane %v999_v38, 4  ;;  %v951_v5 = vadd.f32 %v950_v8, %v949_v28  ;;  %v977_v42 = vrot.slane %v976_v22, 1 }
 0x39c   : > { %v986_v47 = vrot.slane %v985_v51, 1  ;;  %v920_v46 = vmax.f32 %v918_v11, %v919_v35  ;;  %v992_v15 = vadd.f32 %v991_v16, %v990_v37  ;;  %v870_v14 = vmax.f32 %v868_v33, %v869_v39 }
 0x39d   : > { %v929_v9 = vmax.f32 %v927_v12, %v928_v52  ;;  %v1001_v36 = vadd.f32 %v1000_v26, %v999_v38  ;;  %v879_v43 = vmax.f32 %v877_v24, %v878_v19  ;;  %v905_v27 = vrot.slane %v904_v32, 1 }
 0x39e   : > { %v914_v23 = vrot.slane %v913_v53, 1  ;;  %v921_v55 = vrot.slane %v920_v46, 2  ;;  %v993_v13 = vrot.slane %v992_v15, 2  ;;  %v1006_v1 = vmul.f32 0.03125, %v942_v3 }
 0x39f   : > { %v930_v30 = vrot.slane %v929_v9, 2  ;;  %v1002_v0 = vrot.slane %v1001_v36, 2  ;;  %v1007_v21 = vmul.f32 0.03125, %v951_v5  ;;  %v978_v18 = vadd.f32 %v977_v42, %v976_v22 }
 0x3a0   : > { %v987_v44 = vadd.f32 %v986_v47, %v985_v51  ;;  %v922_v56 = vmax.f32 %v920_v46, %v921_v55  ;;  %v994_v25 = vadd.f32 %v993_v13, %v992_v15  ;;  %v906_v11 = vmax.f32 %v904_v32, %v905_v27 }
 0x3a1   : > { %v931_v28 = vmax.f32 %v929_v9, %v930_v30  ;;  %v1003_v8 = vadd.f32 %v1002_v0, %v1001_v36  ;;  %v915_v12 = vmax.f32 %v913_v53, %v914_v23  ;;  %v1025_v33 = vsel %vm478_vm5, %v2806_v49, %v879_v43 }
 0x3a2   : > { %v1022_v24 = vsel %vm478_vm5, %v2804_v34, %v870_v14  ;;  %v923_v39 = vrot.slane %v922_v56, 1  ;;  %v995_v19 = vrot.slane %v994_v25, 1  ;;  %v1010_v38 = vmul.f32 0.03125, %v978_v18 }
 0x3a3   : > { %v1004_v52 = vrot.slane %v1003_v8, 1  ;;  %v932_v37 = vrot.slane %v931_v28, 1  ;;  %v1011_v35 = vmul.f32 0.03125, %v987_v44  ;;  %v1041_v47 = vsel %vm478_vm5, %v1009_v7, %v1007_v21 }
 0x3a4   : > { %v1038_v46 = vsel %vm478_vm5, %v1008_v31, %v1006_v1  ;;  %v924_v15 = vmax.f32 %v922_v56, %v923_v39  ;;  %v996_v42 = vadd.f32 %v995_v19, %v994_v25  ;;  %v1026_v53 = vsel %vm480_vm6, %v915_v12, %v1025_v33 }
 0x3a5   : > { %v933_v27 = vmax.f32 %v931_v28, %v932_v37  ;;  %v1005_v32 = vadd.f32 %v1004_v52, %v1003_v8  ;;  %v1023_v49 = vsel %vm480_vm6, %v906_v11, %v1022_v24  ;;  %v1042_v7 = vsel %vm480_vm6, %v1011_v35, %v1041_v47 }
 0x3a6   : > { %v1012_v22 = vmul.f32 0.03125, %v996_v42  ;;  %v1024_v34 = vsel %vm482_vm9, %v924_v15, %v1023_v49  ;;  %v1039_v31 = vsel %vm480_vm6, %v1010_v38, %v1038_v46  ;;  %v2194_v33 = vmov 1966171168  }
 0x3a7   : > { %v1027_v14 = vsel %vm482_vm9, %v933_v27, %v1026_v53  ;;  %v1013_v51 = vmul.f32 0.03125, %v1005_v32  ;;  %v1046_v26 = vpack.c.bf16 %v1024_v34, %v1024_v34  ;;  %v1532_v24 = vunpack.c.l.s4 %v2194_v33  ;;  %v3067_v33 = vld [vmem:[#allocation17_spill] sm:$0xff] }
 0x3a8   : > { %v1047_v16 = vpack.c.bf16 %v1027_v14, %v1027_v14  ;;  %v1040_v5 = vsel %vm482_vm9, %v1012_v22, %v1039_v31 }
 0x3a9   : > { %v1043_v3 = vsel %vm482_vm9, %v1013_v51, %v1042_v7  ;;  %v1048_v36 = vpack.c.bf16 %v1040_v5, %v1040_v5  ;;  %v1533_v39 = vunpack.c.0.s8 %v1532_v24 }
 0x3aa   : > { %1466 = vmatprep.mubr.bf16.mxu0 %v1047_v16  ;;  %v1049_v9 = vpack.c.bf16 %v1043_v3, %v1043_v3 }
 0x3ab   : > { %1467 = vmatmul.mubr.bf16.vlgmr.msra.gmra.mrb[4].mxu0 %v1046_v26  ;;  %v1536_v52 = vsub.s32 %v1533_v39, %v2564_v62  ;;  %v3068_v39 = vld [vmem:[#allocation18_spill] sm:$0xff] }
 0x3ac   : > { %1507 = vmatprep.mubr.bf16.mxu1 %v1049_v9 }
 0x3ad   : > { %1508 = vmatmul.mubr.bf16.vlgmr.msra.gmra.mrb[4].mxu1 %v1048_v36 }
 0x47e   : > { %v1468_v43 = vpop.f32.mrb[4].mxu0 }
 0x47f   : > { %v1470_v23 = vpop.f32.mrb[5].mxu0 }
 0x480   : > { %v1472_v55 = vpop.f32.mrb[6].mxu0  ;;  %v1509_v30 = vpop.f32.mrb[4].mxu1 }
 0x481   : > { %v1510_v13 = vadd.f32 %v1509_v30, %v1468_v43  ;;  %v1473_v0 = vpop.f32.mrb[7].mxu0  ;;  %v1511_v1 = vpop.f32.mrb[5].mxu1  ;;  %v3059_v43 = vld [vmem:[#allocation13_spill] sm:$0xff]  ;;  %v3060_v55 = vld [vmem:[#allocation11_spill] sm:$0xff] }
 0x482   : > { %v1512_v21 = vadd.f32 %v1511_v1, %v1470_v23  ;;  %v1513_v18 = vpop.f32.mrb[6].mxu1  ;;  %v3062_v1 = vld [vmem:[#allocation26_spill] sm:$0xff] }
 0x483   : > { %v1837_v44 = vmul.f32 -1.442695, %v1510_v13  ;;  %v1514_v56 = vpop.f32.mrb[7].mxu1  ;;  %v3061_v13 = vld [vmem:[#allocation12_spill] sm:$0xff]  ;;  %v3063_v18 = vld [vmem:[#allocation27_spill] sm:$0xff] }
 0x484   : > { %v1838_v28 = vmul.f32 -1.442695, %v1512_v21  ;;  %v3064_v56 = vld [vmem:[#allocation14_spill] sm:$0xff] }
 0x485   : > { %2047 = vpow2.f32 %v1837_v44 }
 0x486   : > { %2049 = vpow2.f32 %v1838_v28 }
 0x48f   : > { %v2048_v25 = vpop.eup %2047 }
 0x490   : > { %v2050_v8 = vpop.eup %2049  ;;  %v1522_v11 = vadd.f32 1.0, %v2048_v25  ;;  %v3065_v25 = vld [vmem:[#allocation15_spill] sm:$0xff] }
 0x491   : > { %v1523_v12 = vadd.f32 1.0, %v2050_v8 }
 0x492   : > { %2051 = vrcp.f32 %v1522_v11  ;;  %v3066_v11 = vld [vmem:[#allocation16_spill] sm:$0xff] }
 0x493   : > { %2053 = vrcp.f32 %v1523_v12 }
 0x49c   : > { %v2052_v19 = vpop.eup %2051 }
 0x49d   : > { %v2054_v37 = vpop.eup %2053 }
 0x49e   : > { %v1530_v38 = vcombine.low %v2052_v19, %v2054_v37 }
 0x4a0   : > { %v1537_v35 = vrot.slane %v1530_v38, %v1536_v52 }
 0x4a2   : > { %v1538_v47 = vcombine.high %v1537_v35, %v1537_v35  ;;  %v1545_v46 = vrot.slane %v1537_v35, %v1536_v52 }
 0x4a4   : > { %v1552_v15 = vrot.slane %v1538_v47, %v1536_v52  ;;  %v1553_v42 = vcombine.high %v1545_v46, %v1545_v46  ;;  %v1558_v27 = vrot.slane %v1545_v46, %v2657_v63  ;;  %v1562_v32 = vrot.slane %v1545_v46, %v2661_v58 }
 0x4a6   : > { %v1554_v53 = vcombine.high %v1552_v15, %v1552_v15  ;;  %v1566_v49 = vrot.slane %v1552_v15, %v2657_v63  ;;  %v1570_v22 = vrot.slane %v1552_v15, %v2661_v58  ;;  %v1574_v14 = vrot.slane %v1553_v42, %v2657_v63 }
 0x4a7   : > { %v1578_v62 = vrot.slane %v1553_v42, %v2661_v58  ;;  %v1595_v34 = vmul.f32 %v1558_v27, %v2673_v61  ;;  %v1596_v51 = vmul.f32 %v1562_v32, %v2676_v59  ;;  %v1597_v16 = vmul.f32 %v1558_v27, %v2667_v17 }
 0x4a8   : > { %v1582_v26 = vrot.slane %v1554_v53, %v2657_v63  ;;  %v1586_v7 = vrot.slane %v1554_v53, %v2661_v58  ;;  %v1598_v31 = vmul.f32 %v1562_v32, %v2670_v54  ;;  %v1599_v3 = vmul.f32 %v1558_v27, %v2689_v2 }
 0x4a9   : > { %v1600_v5 = vmul.f32 %v1562_v32, %v2692_v4  ;;  %v1601_v9 = vmul.f32 %v1558_v27, %v2775_v48  ;;  %v1602_v36 = vmul.f32 %v1562_v32, %v2778_v10  ;;  %v1603_v61 = vmul.f32 %v1566_v49, %v2699_v6  ;;  %1627 = vst [vmem:[%s2864_s8] sm:$0xff] %v1595_v34  ;;  %v3054_v6 = vld [vmem:[#allocation22_spill] sm:$0xff]  ;;  %v3058_v10 = vld [vmem:[#allocation28_spill] sm:$0xff] }
 0x4aa   : > { %1628 = vst [vmem:[%s2864_s8 + $0x8] sm:$0xff] %v1596_v51  ;;  %1629 = vst [vmem:[%s2864_s8 + $0x10] sm:$0xff] %v1597_v16  ;;  %v1604_v63 = vmul.f32 %v1570_v22, %v2702_v41  ;;  %v1605_v58 = vmul.f32 %v1566_v49, %v2679_v50  ;;  %v1606_v17 = vmul.f32 %v1570_v22, %v2682_v57  ;;  %v3055_v50 = vld [vmem:[#allocation23_spill] sm:$0xff] }
 0x4ab   : > { %v1607_v54 = vmul.f32 %v1566_v49, %v2721_v29  ;;  %1630 = vst [vmem:[%s2864_s8 + $0x18] sm:$0xff] %v1598_v31  ;;  %1631 = vst [vmem:[%s2864_s8 + $0x20] sm:$0xff] %v1599_v3  ;;  %v1608_v59 = vmul.f32 %v1570_v22, %v2724_v20  ;;  %v1609_v2 = vmul.f32 %v1566_v49, %v2745_v45  ;;  %v3056_v29 = vld [vmem:[#allocation24_spill] sm:$0xff]  ;;  %v3057_v45 = vld [vmem:[#allocation25_spill] sm:$0xff] }
 0x4ac   : > { %v1610_v4 = vmul.f32 %v1570_v22, %v2748_v60  ;;  %v1611_v41 = vmul.f32 %v1574_v14, %v3054_v6  ;;  %1632 = vst [vmem:[%s2864_s8 + $0x28] sm:$0xff] %v1600_v5  ;;  %1633 = vst [vmem:[%s2864_s8 + $0x30] sm:$0xff] %v1601_v9  ;;  %v1612_v57 = vmul.f32 %v1578_v62, %v3055_v50 }
 0x4ad   : > { %1634 = vst [vmem:[%s2864_s8 + $0x38] sm:$0xff] %v1602_v36  ;;  %1635 = vst [vmem:[%s2864_s8 + $0x40] sm:$0xff] %v1603_v61  ;;  %v1613_v20 = vmul.f32 %v1574_v14, %v3056_v29  ;;  %v1614_v48 = vmul.f32 %v1578_v62, %v3057_v45  ;;  %v1615_v60 = vmul.f32 %v1574_v14, %v3058_v10 }
 0x4ae   : > { %1636 = vst [vmem:[%s2864_s8 + $0x48] sm:$0xff] %v1604_v63  ;;  %1637 = vst [vmem:[%s2864_s8 + $0x50] sm:$0xff] %v1605_v58  ;;  %v1616_v23 = vmul.f32 %v1578_v62, %v3059_v43  ;;  %v1617_v30 = vmul.f32 %v1574_v14, %v3060_v55  ;;  %v1618_v0 = vmul.f32 %v1578_v62, %v3061_v13 }
 0x4af   : > { %1638 = vst [vmem:[%s2864_s8 + $0x58] sm:$0xff] %v1606_v17  ;;  %1639 = vst [vmem:[%s2864_s8 + $0x60] sm:$0xff] %v1607_v54  ;;  %v1619_v21 = vmul.f32 %v1582_v26, %v3062_v1  ;;  %v1620_v44 = vmul.f32 %v1586_v7, %v3063_v18  ;;  %v1621_v28 = vmul.f32 %v1582_v26, %v3064_v56 }
 0x4b0   : > { %1640 = vst [vmem:[%s2864_s8 + $0x68] sm:$0xff] %v1608_v59  ;;  %1641 = vst [vmem:[%s2864_s8 + $0x70] sm:$0xff] %v1609_v2  ;;  %v1622_v8 = vmul.f32 %v1586_v7, %v3065_v25  ;;  %v1623_v12 = vmul.f32 %v1582_v26, %v3066_v11  ;;  %v1624_v24 = vmul.f32 %v1586_v7, %v3067_v33 }
 0x4b1   : > { %1642 = vst [vmem:[%s2864_s8 + $0x78] sm:$0xff] %v1610_v4  ;;  %1643 = vst [vmem:[%s2864_s8 + $0x80] sm:$0xff] %v1611_v41  ;;  %v1625_v19 = vmul.f32 %v1582_v26, %v3068_v39  ;;  %v1626_v52 = vmul.f32 %v1586_v7, %v2824_v40 }
 0x4b2   : > { %1644 = vst [vmem:[%s2864_s8 + $0x88] sm:$0xff] %v1612_v57  ;;  %1645 = vst [vmem:[%s2864_s8 + $0x90] sm:$0xff] %v1613_v20 }
 0x4b3   : > { %1646 = vst [vmem:[%s2864_s8 + $0x98] sm:$0xff] %v1614_v48  ;;  %1647 = vst [vmem:[%s2864_s8 + $0xa0] sm:$0xff] %v1615_v60 }
 0x4b4   : > { %1648 = vst [vmem:[%s2864_s8 + $0xa8] sm:$0xff] %v1616_v23  ;;  %1649 = vst [vmem:[%s2864_s8 + $0xb0] sm:$0xff] %v1617_v30 }
 0x4b5   : > { %1650 = vst [vmem:[%s2864_s8 + $0xb8] sm:$0xff] %v1618_v0  ;;  %1651 = vst [vmem:[%s2864_s8 + $0xc0] sm:$0xff] %v1619_v21 }
 0x4b6   : > { %1652 = vst [vmem:[%s2864_s8 + $0xc8] sm:$0xff] %v1620_v44  ;;  %1653 = vst [vmem:[%s2864_s8 + $0xd0] sm:$0xff] %v1621_v28 }
 0x4b7   : > { %1654 = vst [vmem:[%s2864_s8 + $0xd8] sm:$0xff] %v1622_v8  ;;  %1655 = vst [vmem:[%s2864_s8 + $0xe0] sm:$0xff] %v1623_v12 }
 0x4b8   : > { %1656 = vst [vmem:[%s2864_s8 + $0xe8] sm:$0xff] %v1624_v24  ;;  %1657 = vst [vmem:[%s2864_s8 + $0xf0] sm:$0xff] %v1625_v19 }
 0x4b9   : > { %1658 = vst [vmem:[%s2864_s8 + $0xf8] sm:$0xff] %v1626_v52 }
 0x4ba   : > { %2126 = shalt.err (!%p2123_p7)
}
 0x4bb   : > { %s2127_s29 = scalar_lea.hbm %s2912_s14, 4096  ;;  %s2131_s5 = scalar_lea.hbm %s2976_s4, 8192 }
 0x4bc   : > { %p2128_p9 = scmp.ne.s32.totalorder %s2912_s14, %s2127_s29  ;;  %p2132_p5 = scmp.lt.u32.totalorder %s2912_s14, %s2976_s4 }
 0x4bd   : > { %p2133_p11 = scmp.lt.u32.totalorder %s2131_s5, %s2127_s29  ;;  %p2135_p4 = scmp.lt.u32.totalorder %s2127_s29, %s2912_s14 }
 0x4be   : > { %p2129_p2 = pnand %p2128_p9, %p2314_p12 }
 0x4bf   : > { %p2134_p1 = por %p2133_p11, %p2132_p5 }
 0x4c0   : > { %p2130_p0 = pneg %p2129_p2 }
 0x4c1   : > { %p2136_p6 = por %p2135_p4, %p2134_p1 }
 0x4c3   : > { %p2137_p8 = pnand %p2136_p6, %p2130_p0 }
 0x4c5   : > { %2140 = shalt.err (!%p2137_p8)
}
 0x4c6   : > { %s2196_s8 = smov 256   ;;  %s2197_s25 = smov 16  }
 0x4c7   : > { %1886 = dma.vmem_to_hbm [thread:$0]  (%p2314_p12), %s2914_s11, 4096, %s2912_s14, %s1660_s20, %s2196_s8, %s2196_s8, %s2197_s25  }
 0x4c8 PF: > { %s1689_s19 = sand.u32 1, %s2171_s15   ;;  %p3069_p10 = scmp.ne.s32.totalorder %s3007_s22, 0 }
 0x4c9   : > { %p3070_p13 = scmp.ge.s32.totalorder %s2183_s18, 2  ;;  %s1690_s13 = scalar_lea.sflag [#allocation4], %s1689_s19 }
 0x4cb   : > { %p1897_p3 = pnand %p3070_p13, %p3069_p10 }
 0x4cd   : > { %2166 = dma.done.wait (!%p1897_p3), %s1690_s13, 4096  }
 0x4ce   : > { %2168 = vsyncadd (!%p1897_p3), %s1690_s13, 4294963200  ;;  %p18_p7 = scmp.ge.s32.totalorder %s2279_s27, 4   ;;  %s3071_s15 = smov %s2175_s16 }
 0x4cf   : > { %s3072_s16 = smov %s2179_s17  ;;  %s3073_s17 = smov %s2310_s24 }
 0x4d0   : > { %s3074_s18 = smov %s2279_s27  ;;  %20 = sbr.rel (!%p18_p7) target bundleno = 6 (0x6), region = 85 }
 0x4d7   :  { %1695 = vsyncpa [#allocation3], 1 }
 0x4d8   :  { %1697 = vsyncpa [#allocation3 + $0x1], 1 }
 0x4d9   :  { %1698 = vsyncpa [#allocation6], 1 }
 0x4da   :  { %1699 = vsyncpa [#allocation4], 1 }
 0x4db   :  { %1701 = vsyncpa [#allocation4 + $0x1], 1 }

</bundles_post_ra>
